<compile_context>
chip_gen: v6e
topology: v6e:2x2x1
jax: 0.10.0
libtpu: 0.0.40
codegen_flags: <defaults>
</compile_context>

<pallas_src>
import jax
import jax.numpy as jnp
from jax.experimental import pallas as pl
from jax.experimental.pallas import tpu as pltpu

LAYER_DIMS = [(67, 50), (50, 50), (50, 30), (30, 24), (24, 24)]
PAD = 128  # TPU lane width; hidden/output feature dims are zero-padded to this.


def _round_up(x, m):
    return ((x + m - 1) // m) * m


def _mlp_kernel(x_ref, w1_ref, wr_ref, b_ref, o_ref):
    # x_ref:  (bt, 67)        input tile (batch on sublanes, features on lanes)
    # w1_ref: (67, 128)       layer-1 weight, output dim zero-padded to 128
    # wr_ref: (4, 128, 128)   layers 2..5 weights, zero-padded
    # b_ref:  (5, 1, 128)     all biases, zero-padded
    # o_ref:  (bt, 24)        output tile
    x = x_ref[...].astype(jnp.float32)

    h = jnp.dot(x, w1_ref[...], preferred_element_type=jnp.float32) + b_ref[0]
    h = jnp.maximum(h, 0.0)

    n_rest = wr_ref.shape[0]
    for i in range(n_rest):
        h = jnp.dot(h, wr_ref[i], preferred_element_type=jnp.float32) + b_ref[i + 1]
        if i + 1 < n_rest:
            h = jnp.maximum(h, 0.0)

    h = jax.nn.sigmoid(h)
    o_ref[...] = h[:, : o_ref.shape[1]].astype(o_ref.dtype)


def pack_params(params):
    """Pack natural-shape (W,b) pairs (W is (in,out)) into padded, stacked arrays."""
    assert len(params) == len(LAYER_DIMS)
    (w1, _), rest = params[0], params[1:]
    in0, out0 = w1.shape
    w1p = jnp.zeros((in0, PAD), jnp.float32).at[:, :out0].set(w1.astype(jnp.float32))

    wr = jnp.zeros((len(rest), PAD, PAD), jnp.float32)
    for i, (w, _) in enumerate(rest):
        wr = wr.at[i, : w.shape[0], : w.shape[1]].set(w.astype(jnp.float32))

    bp = jnp.zeros((len(params), 1, PAD), jnp.float32)
    for i, (_, b) in enumerate(params):
        bp = bp.at[i, 0, : b.shape[0]].set(b.astype(jnp.float32))
    return w1p, wr, bp


def salmon_swirl_forward(x, packed_params, *, batch_tile=512, out_dim=24):
    """x: (N, 67) float32 or bfloat16.  packed_params: output of pack_params."""
    w1p, wr, bp = packed_params
    n, in_dim = x.shape
    assert in_dim == w1p.shape[0]

    # Largest sublane-aligned tile that is useful for this N (multiple of 8).
    bt = max(8, min(_round_up(batch_tile, 8), _round_up(n, 8)))
    grid = (pl.cdiv(n, bt),)  # ragged tail handled by Pallas OOB masking; no jnp.pad.

    x_spec = pl.BlockSpec((bt, in_dim), lambda i: (i, 0))
    out_spec = pl.BlockSpec((bt, out_dim), lambda i: (i, 0))
    # Grid-invariant, full-array parameter blocks (one DMA each).
    w1_spec = pl.BlockSpec(w1p.shape, lambda i: (0, 0))
    wr_spec = pl.BlockSpec(wr.shape, lambda i: (0, 0, 0))
    b_spec = pl.BlockSpec(bp.shape, lambda i: (0, 0, 0))

    out = pl.pallas_call(
        _mlp_kernel,
        out_shape=jax.ShapeDtypeStruct((n, out_dim), x.dtype),
        grid_spec=pltpu.PrefetchScalarGridSpec(
            num_scalar_prefetch=0,
            grid=grid,
            in_specs=[x_spec, w1_spec, wr_spec, b_spec],
            out_specs=out_spec,
        ),
        compiler_params=pltpu.CompilerParams(
            dimension_semantics=("parallel",),
            vmem_limit_bytes=64 * 1024 * 1024,
        ),
    )(x, w1p, wr, bp)
    return out


def init_params(key):
    """Deterministic init matching nn.Linear default (uniform ±1/sqrt(fan_in)).
    Weights returned as (in_features, out_features)."""
    params = []
    for (fi, fo) in LAYER_DIMS:
        key, kw, kb = jax.random.split(key, 3)
        bound = 1.0 / jnp.sqrt(fi)
        w = jax.random.uniform(kw, (fi, fo), jnp.float32, -bound, bound)
        b = jax.random.uniform(kb, (fo,), jnp.float32, -bound, bound)
        params.append((w, b))
    return params


def reference_forward(x, params):
    h = x
    for idx, (w, b) in enumerate(params):
        h = h @ w + b
        h = jax.nn.sigmoid(h) if idx == len(params) - 1 else jnp.maximum(h, 0.0)
    return h


if __name__ == "__main__":
    key = jax.random.PRNGKey(0)
    k_in, k_par = jax.random.split(key)

    params = init_params(k_par)
    packed = pack_params(params)

    # Multi-step grid with a ragged last block (grid = cdiv(600, 256) = 3).
    x = jax.random.normal(k_in, (600, 67), jnp.float32)
    y = jax.block_until_ready(salmon_swirl_forward(x, packed, batch_tile=256))
    y_ref = reference_forward(x, params)
    assert y.shape == (600, 24)
    assert jnp.allclose(y, y_ref, atol=1e-5, rtol=1e-5)

    # Tiny-batch path (tile auto-shrinks to 8 sublanes).
    x_small = x[:8]
    y_small = jax.block_until_ready(salmon_swirl_forward(x_small, packed))
    assert y_small.shape == (8, 24)
    assert jnp.allclose(y_small, y_ref[:8], atol=1e-5, rtol=1e-5)

    print("KERNEL_OK")
</pallas_src>

<mosaic_0001>
module attributes {stable_mosaic.version = 11 : i64} {
  func.func @_mlp_kernel(%arg0: i32, %arg1: memref<256x67xf32, #tpu.memory_space<vmem>>, %arg2: memref<67x128xf32, #tpu.memory_space<vmem>>, %arg3: memref<4x128x128xf32, #tpu.memory_space<vmem>>, %arg4: memref<5x1x128xf32, #tpu.memory_space<vmem>>, %arg5: memref<256x24xf32, #tpu.memory_space<vmem>>) attributes {dimension_semantics = [#tpu.dimension_semantics<parallel>], iteration_bounds = array<i64: 3>, scalar_prefetch = 0 : i64, scratch_operands = 0 : i64, tpu.core_type = #tpu.core_type<tc>, window_params = [{transform_indices = @transform_0, window_bounds = array<i64: 256, 67>}, {pipeline_mode = #tpu.pipeline_mode<synchronous>, transform_indices = @transform_1, window_bounds = array<i64: 67, 128>}, {pipeline_mode = #tpu.pipeline_mode<synchronous>, transform_indices = @transform_2, window_bounds = array<i64: 4, 128, 128>}, {pipeline_mode = #tpu.pipeline_mode<synchronous>, transform_indices = @transform_3, window_bounds = array<i64: 5, 1, 128>}, {transform_indices = @transform_4, window_bounds = array<i64: 256, 24>}]} {
    %c0 = arith.constant 0 : index
    %c0_0 = arith.constant 0 : index
    %0 = vector.load %arg1[%c0, %c0_0] : memref<256x67xf32, #tpu.memory_space<vmem>>, vector<256x67xf32>
    %c0_1 = arith.constant 0 : index
    %c0_2 = arith.constant 0 : index
    %1 = vector.load %arg2[%c0_1, %c0_2] : memref<67x128xf32, #tpu.memory_space<vmem>>, vector<67x128xf32>
    %cst = arith.constant dense<0.000000e+00> : vector<256x128xf32>
    %2 = tpu.matmul %0, %1, %cst {dimension_numbers = #tpu.dot_dimension_numbers<[1], [0], [0], [1], [0, 0, 1, 1], [], []>} : vector<256x67xf32>, vector<67x128xf32>, vector<256x128xf32> -> vector<256x128xf32>
    %c0_3 = arith.constant 0 : index
    %c0_4 = arith.constant 0 : index
    %c0_5 = arith.constant 0 : index
    %3 = vector.load %arg4[%c0_3, %c0_4, %c0_5] : memref<5x1x128xf32, #tpu.memory_space<vmem>>, vector<1x1x128xf32>
    %4 = vector.shape_cast %3 : vector<1x1x128xf32> to vector<1x128xf32>
    %5 = vector.broadcast %4 : vector<1x128xf32> to vector<256x128xf32>
    %6 = arith.addf %2, %5 : vector<256x128xf32>
    %cst_6 = arith.constant 0.000000e+00 : f32
    %7 = vector.broadcast %cst_6 : f32 to vector<256x128xf32>
    %8 = arith.maximumf %6, %7 : vector<256x128xf32>
    %c0_7 = arith.constant 0 : index
    %c0_8 = arith.constant 0 : index
    %c0_9 = arith.constant 0 : index
    %9 = vector.load %arg3[%c0_7, %c0_8, %c0_9] : memref<4x128x128xf32, #tpu.memory_space<vmem>>, vector<1x128x128xf32>
    %10 = vector.shape_cast %9 : vector<1x128x128xf32> to vector<128x128xf32>
    %cst_10 = arith.constant dense<0.000000e+00> : vector<256x128xf32>
    %11 = tpu.matmul %8, %10, %cst_10 {dimension_numbers = #tpu.dot_dimension_numbers<[1], [0], [0], [1], [0, 0, 1, 1], [], []>} : vector<256x128xf32>, vector<128x128xf32>, vector<256x128xf32> -> vector<256x128xf32>
    %c1 = arith.constant 1 : index
    %c0_11 = arith.constant 0 : index
    %c0_12 = arith.constant 0 : index
    %12 = vector.load %arg4[%c1, %c0_11, %c0_12] : memref<5x1x128xf32, #tpu.memory_space<vmem>>, vector<1x1x128xf32>
    %13 = vector.shape_cast %12 : vector<1x1x128xf32> to vector<1x128xf32>
    %14 = vector.broadcast %13 : vector<1x128xf32> to vector<256x128xf32>
    %15 = arith.addf %11, %14 : vector<256x128xf32>
    %cst_13 = arith.constant 0.000000e+00 : f32
    %16 = vector.broadcast %cst_13 : f32 to vector<256x128xf32>
    %17 = arith.maximumf %15, %16 : vector<256x128xf32>
    %c1_14 = arith.constant 1 : index
    %c0_15 = arith.constant 0 : index
    %c0_16 = arith.constant 0 : index
    %18 = vector.load %arg3[%c1_14, %c0_15, %c0_16] : memref<4x128x128xf32, #tpu.memory_space<vmem>>, vector<1x128x128xf32>
    %19 = vector.shape_cast %18 : vector<1x128x128xf32> to vector<128x128xf32>
    %cst_17 = arith.constant dense<0.000000e+00> : vector<256x128xf32>
    %20 = tpu.matmul %17, %19, %cst_17 {dimension_numbers = #tpu.dot_dimension_numbers<[1], [0], [0], [1], [0, 0, 1, 1], [], []>} : vector<256x128xf32>, vector<128x128xf32>, vector<256x128xf32> -> vector<256x128xf32>
    %c2 = arith.constant 2 : index
    %c0_18 = arith.constant 0 : index
    %c0_19 = arith.constant 0 : index
    %21 = vector.load %arg4[%c2, %c0_18, %c0_19] : memref<5x1x128xf32, #tpu.memory_space<vmem>>, vector<1x1x128xf32>
    %22 = vector.shape_cast %21 : vector<1x1x128xf32> to vector<1x128xf32>
    %23 = vector.broadcast %22 : vector<1x128xf32> to vector<256x128xf32>
    %24 = arith.addf %20, %23 : vector<256x128xf32>
    %cst_20 = arith.constant 0.000000e+00 : f32
    %25 = vector.broadcast %cst_20 : f32 to vector<256x128xf32>
    %26 = arith.maximumf %24, %25 : vector<256x128xf32>
    %c2_21 = arith.constant 2 : index
    %c0_22 = arith.constant 0 : index
    %c0_23 = arith.constant 0 : index
    %27 = vector.load %arg3[%c2_21, %c0_22, %c0_23] : memref<4x128x128xf32, #tpu.memory_space<vmem>>, vector<1x128x128xf32>
    %28 = vector.shape_cast %27 : vector<1x128x128xf32> to vector<128x128xf32>
    %cst_24 = arith.constant dense<0.000000e+00> : vector<256x128xf32>
    %29 = tpu.matmul %26, %28, %cst_24 {dimension_numbers = #tpu.dot_dimension_numbers<[1], [0], [0], [1], [0, 0, 1, 1], [], []>} : vector<256x128xf32>, vector<128x128xf32>, vector<256x128xf32> -> vector<256x128xf32>
    %c3 = arith.constant 3 : index
    %c0_25 = arith.constant 0 : index
    %c0_26 = arith.constant 0 : index
    %30 = vector.load %arg4[%c3, %c0_25, %c0_26] : memref<5x1x128xf32, #tpu.memory_space<vmem>>, vector<1x1x128xf32>
    %31 = vector.shape_cast %30 : vector<1x1x128xf32> to vector<1x128xf32>
    %32 = vector.broadcast %31 : vector<1x128xf32> to vector<256x128xf32>
    %33 = arith.addf %29, %32 : vector<256x128xf32>
    %cst_27 = arith.constant 0.000000e+00 : f32
    %34 = vector.broadcast %cst_27 : f32 to vector<256x128xf32>
    %35 = arith.maximumf %33, %34 : vector<256x128xf32>
    %c3_28 = arith.constant 3 : index
    %c0_29 = arith.constant 0 : index
    %c0_30 = arith.constant 0 : index
    %36 = vector.load %arg3[%c3_28, %c0_29, %c0_30] : memref<4x128x128xf32, #tpu.memory_space<vmem>>, vector<1x128x128xf32>
    %37 = vector.shape_cast %36 : vector<1x128x128xf32> to vector<128x128xf32>
    %cst_31 = arith.constant dense<0.000000e+00> : vector<256x128xf32>
    %38 = tpu.matmul %35, %37, %cst_31 {dimension_numbers = #tpu.dot_dimension_numbers<[1], [0], [0], [1], [0, 0, 1, 1], [], []>} : vector<256x128xf32>, vector<128x128xf32>, vector<256x128xf32> -> vector<256x128xf32>
    %c4 = arith.constant 4 : index
    %c0_32 = arith.constant 0 : index
    %c0_33 = arith.constant 0 : index
    %39 = vector.load %arg4[%c4, %c0_32, %c0_33] : memref<5x1x128xf32, #tpu.memory_space<vmem>>, vector<1x1x128xf32>
    %40 = vector.shape_cast %39 : vector<1x1x128xf32> to vector<1x128xf32>
    %41 = vector.broadcast %40 : vector<1x128xf32> to vector<256x128xf32>
    %42 = arith.addf %38, %41 : vector<256x128xf32>
    %43 = arith.negf %42 : vector<256x128xf32>
    %44 = math.exp %43 : vector<256x128xf32>
    %cst_34 = arith.constant 1.000000e+00 : f32
    %45 = vector.broadcast %cst_34 : f32 to vector<256x128xf32>
    %46 = arith.addf %45, %44 : vector<256x128xf32>
    %47 = arith.divf %45, %46 : vector<256x128xf32>
    %48 = vector.extract_strided_slice %47 {offsets = [0, 0], sizes = [256, 24], strides = [1, 1]} : vector<256x128xf32> to vector<256x24xf32>
    %c0_35 = arith.constant 0 : index
    %c0_36 = arith.constant 0 : index
    %49 = vector.load %arg5[%c0_35, %c0_36] : memref<256x24xf32, #tpu.memory_space<vmem>>, vector<256x24xf32>
    tpu.vector_store %arg5[%c0_35, %c0_36], %48 {strides = array<i32>} : memref<256x24xf32, #tpu.memory_space<vmem>>, vector<256x24xf32>,
    return
  }
  func.func @transform_0(%arg0: i32) -> (i32, i32) {
    %c0_i32 = arith.constant 0 : i32
    %c0_i32_0 = arith.constant 0 : i32
    return %arg0, %c0_i32 : i32, i32
  }
  func.func @transform_1(%arg0: i32) -> (i32, i32) {
    %c0_i32 = arith.constant 0 : i32
    %c0_i32_0 = arith.constant 0 : i32
    %c0_i32_1 = arith.constant 0 : i32
    return %c0_i32, %c0_i32_0 : i32, i32
  }
  func.func @transform_2(%arg0: i32) -> (i32, i32, i32) {
    %c0_i32 = arith.constant 0 : i32
    %c0_i32_0 = arith.constant 0 : i32
    %c0_i32_1 = arith.constant 0 : i32
    %c0_i32_2 = arith.constant 0 : i32
    return %c0_i32, %c0_i32_0, %c0_i32_1 : i32, i32, i32
  }
  func.func @transform_3(%arg0: i32) -> (i32, i32, i32) {
    %c0_i32 = arith.constant 0 : i32
    %c0_i32_0 = arith.constant 0 : i32
    %c0_i32_1 = arith.constant 0 : i32
    %c0_i32_2 = arith.constant 0 : i32
    return %c0_i32, %c0_i32_0, %c0_i32_1 : i32, i32, i32
  }
  func.func @transform_4(%arg0: i32) -> (i32, i32) {
    %c0_i32 = arith.constant 0 : i32
    %c0_i32_0 = arith.constant 0 : i32
    return %arg0, %c0_i32 : i32, i32
  }
}

</mosaic_0001>

<bundles_post_ra>
// kernel: tpu_custom_call.1
= control target key start
LH: loop header
LB: loop body
LE: loop exit
PB: predicated region body
PF: predicated region fallthrough
CT: control target
= control target key end

     0   :  { %s3400_s15 = smov 0   ;;  %s3402_s16 = smov 0   ;;  %s4122_s0 = inlined_call_operand.vmem [shape: f32[600,67], index: 0, kind: input, shape index: {}]   ;;  %s4123_s1 = inlined_call_operand.vmem [shape: f32[67,128], index: 1, kind: input, shape index: {}]   ;;  %s4124_s2 = inlined_call_operand.vmem [shape: f32[4,128,128], index: 2, kind: input, shape index: {}]   ;;  %s4125_s3 = inlined_call_operand.vmem [shape: f32[5,1,128], index: 3, kind: input, shape index: {}]   ;;  %s4126_s4 = inlined_call_operand.vmem [shape: f32[600,24], index: 4, kind: output, shape index: {}]  }
   0x1   :  { %s3404_s17 = smov 0  }
   0x2 LB: > { %s3413_s18 = sadd.s32 4294967295, %s3341_s17   ;;  %s3415_s19 = sadd.s32 1, %s3341_s17   ;;  %s3341_s17 = sphi %s3404_s17, %s4135_s17   ;;  %s3337_s16 = sphi %s3402_s16, %s4134_s16   ;;  %s3333_s15 = sphi %s3400_s15, %s4133_s15  }
   0x3   : > { %s107_s20 = ssub.s32 %s3341_s17, %s3415_s19  ;;  %s110_s21 = sadd.s32 1, %s3337_s16 }
   0x4   : > { %p108_p0 = scmp.eq.s32.totalorder %s107_s20, 0  ;;  %p120_p1 = scmp.ne.s32.totalorder %s3337_s16, %s3333_s15 }
   0x5   : > { %p121_p2 = scmp.eq.s32.totalorder %s3413_s18, 2  ;;  %p2288_p3 = scmp.ge.s32.totalorder %s3341_s17, 1 }
   0x6   : > { %s3423_s22 = scalar_select %p108_p0, %s3337_s16, %s110_s21  }
   0x7   : > { %p3425_p4 = por %p121_p2, %p120_p1  ;;  %p171_p5 = scmp.lt.s32.totalorder %s3341_s17, 4 }
   0x9   : > { %p172_p6 = pnand %p2288_p3, %p171_p5 }
   0xa   : > { %s3436_s28 = sshll.u32 (!%p172_p6), %s3413_s18, 5  ;;  %s197_s9 = sand.u32 (!%p172_p6), 1, %s3333_s15  }
   0xb   : > { %175 = sbr.rel (%p172_p6) target bundleno = 1174 (0x496), region = 36  ;;  %p205_p7 = scmp.lt.s32.totalorder (!%p172_p6), %s3436_s28, 74 }
   0xc   : > { %s2289_s10 = sshll.u32 (!%p172_p6), %s197_s9, 8 }
   0xd   : > { %s3902_s15 = scalar_lea.vmem (!%p172_p6), [#allocation2], %s2289_s10  }
  0x10   : > { %v259_v0 = vld [vmem:[%s4123_s1 + $0x40] sm:$0x7]  ;;  %vm364_vm0 = vcmask 1042432   ;;  %v258_v1 = vld [vmem:[%s4123_s1 + $0x38] sm:$0xff]  ;;  %v257_v2 = vld [vmem:[%s4123_s1 + $0x30] sm:$0xff]  ;;  %s206_s5 = scalar_select %p205_p7, %s3436_s28, 74 }
  0x11   : > { %2667 = vmatprep.subr.msk.mxu0 %vm364_vm0, %v259_v0  ;;  %3053 = vmatprep.subr.msk.mxu1 %vm364_vm0, %v259_v0  ;;  %v256_v3 = vld [vmem:[%s4123_s1 + $0x28] sm:$0xff]  ;;  %vm267_vm1 = vcmask 547840   ;;  %v255_v4 = vld [vmem:[%s4123_s1 + $0x20] sm:$0xff]  ;;  %v254_v6 = vld [vmem:[%s4123_s1 + $0x18] sm:$0xff]  ;;  %vm1912_vm2 = vcmask 195584   ;;  %s1953_s11 = ssub.s32 (%p3425_p4), 75, %s3436_s28 }
  0x12   : > { %2668 = vmatpush3.msk.msra.mxu0 %vm364_vm0, %v259_v0  ;;  %3062 = vmatpush3.msk.msra.mxu1 %vm364_vm0, %v259_v0  ;;  %s2291_s8 = sshll.u32 %s206_s5, 3  ;;  %v253_v7 = vld [vmem:[%s4123_s1 + $0x10] sm:$0xff]  ;;  %v252_v8 = vld [vmem:[%s4123_s1 + $0x8] sm:$0xff]  ;;  %v251_v9 = vld [vmem:[%s4123_s1] sm:$0xff]  ;;  %s2431_s12 = sshll.u32 (%p3425_p4), %s3413_s18, 8 }
  0x13   : > { %2669 = vmatprep.subr.mxu0 %v258_v1  ;;  %3054 = vmatprep.subr.mxu1 %v258_v1  ;;  %s3452_s13 = scalar_lea.vmem %s4122_s0, %s2291_s8  ;;  %v640_v14 = vld [vmem:[%s4124_s2 + $0x78] sm:$0xff]  ;;  %v639_v17 = vld [vmem:[%s4124_s2 + $0x70] sm:$0xff]  ;;  %v638_v20 = vld [vmem:[%s4124_s2 + $0x68] sm:$0xff]  ;;  %p1954_p8 = scmp.lt.s32.totalorder (%p3425_p4), %s1953_s11, 32 }
  0x14   : > { %2670 = vmatpush3.msra.mxu0 %v258_v1  ;;  %3063 = vmatpush3.msra.mxu1 %v258_v1  ;;  %v219_v5 = vld [vmem:[%s3452_s13] sm:$0xff]  ;;  %v220_v10 = vld [vmem:[%s3452_s13 + $0x8] sm:$0xff]  ;;  %v221_v11 = vld [vmem:[%s3452_s13 + $0x10] sm:$0xff]  ;;  %s3990_s20 = scalar_lea.vmem (%p3425_p4), %s4126_s4, %s2431_s12  }
  0x15   : > { %2671 = vmatprep.subr.mxu0 %v257_v2  ;;  %3055 = vmatprep.subr.mxu1 %v257_v2  ;;  %v235_v12 = vld [vmem:[%s3452_s13 + $0x80] sm:$0xff]  ;;  %v236_v13 = vld [vmem:[%s3452_s13 + $0x88] sm:$0xff]  ;;  %v237_v15 = vld [vmem:[%s3452_s13 + $0x90] sm:$0xff] }
  0x16   : > { %2672 = vmatpush3.msra.mxu0 %v257_v2  ;;  %3064 = vmatpush3.msra.mxu1 %v257_v2  ;;  %v222_v16 = vld [vmem:[%s3452_s13 + $0x18] sm:$0xff]  ;;  %v223_v18 = vld [vmem:[%s3452_s13 + $0x20] sm:$0xff]  ;;  %v224_v22 = vld [vmem:[%s3452_s13 + $0x28] sm:$0xff] }
  0x17   : > { %2673 = vmatprep.subr.mxu0 %v256_v3  ;;  %3056 = vmatprep.subr.mxu1 %v256_v3  ;;  %v238_v19 = vld [vmem:[%s3452_s13 + $0x98] sm:$0xff]  ;;  %v239_v21 = vld [vmem:[%s3452_s13 + $0xa0] sm:$0xff]  ;;  %v225_v24 = vld [vmem:[%s3452_s13 + $0x30] sm:$0xff] }
  0x18   : > { %2674 = vmatpush3.msra.mxu0 %v256_v3  ;;  %2685 = vmatprep.mubr.msk.f32.mxu0 %vm267_vm1, %v219_v5  ;;  %v637_v23 = vld [vmem:[%s4124_s2 + $0x60] sm:$0xff]  ;;  %v240_v25 = vld [vmem:[%s3452_s13 + $0xa8] sm:$0xff]  ;;  %v636_v26 = vld [vmem:[%s4124_s2 + $0x58] sm:$0xff] }
  0x19   : > { %2675 = vmatprep.subr.mxu0 %v255_v4  ;;  %3065 = vmatpush3.msra.mxu1 %v256_v3  ;;  %v241_v27 = vld [vmem:[%s3452_s13 + $0xb0] sm:$0xff]  ;;  %v226_v28 = vld [vmem:[%s3452_s13 + $0x38] sm:$0xff]  ;;  %v227_v30 = vld [vmem:[%s3452_s13 + $0x40] sm:$0xff] }
  0x1a   : > { %2676 = vmatpush3.msra.mxu0 %v255_v4  ;;  %3057 = vmatprep.subr.mxu1 %v255_v4  ;;  %v635_v29 = vld [vmem:[%s4124_s2 + $0x50] sm:$0xff]  ;;  %v242_v31 = vld [vmem:[%s3452_s13 + $0xb8] sm:$0xff]  ;;  %v634_v32 = vld [vmem:[%s4124_s2 + $0x48] sm:$0xff] }
  0x1b   : > { %2677 = vmatprep.subr.mxu0 %v254_v6  ;;  %3066 = vmatpush3.msra.mxu1 %v255_v4  ;;  %v243_v33 = vld [vmem:[%s3452_s13 + $0xc0] sm:$0xff]  ;;  %v228_v34 = vld [vmem:[%s3452_s13 + $0x48] sm:$0xff]  ;;  %v229_v36 = vld [vmem:[%s3452_s13 + $0x50] sm:$0xff] }
  0x1c   : > { %2678 = vmatpush3.msra.mxu0 %v254_v6  ;;  %3058 = vmatprep.subr.mxu1 %v254_v6  ;;  %v633_v35 = vld [vmem:[%s4124_s2 + $0x40] sm:$0xff]  ;;  %v244_v37 = vld [vmem:[%s3452_s13 + $0xc8] sm:$0xff]  ;;  %v632_v38 = vld [vmem:[%s4124_s2 + $0x38] sm:$0xff] }
  0x1d   : > { %2679 = vmatprep.subr.mxu0 %v253_v7  ;;  %3067 = vmatpush3.msra.mxu1 %v254_v6  ;;  %v245_v39 = vld [vmem:[%s3452_s13 + $0xd0] sm:$0xff]  ;;  %v230_v40 = vld [vmem:[%s3452_s13 + $0x58] sm:$0xff]  ;;  %v231_v42 = vld [vmem:[%s3452_s13 + $0x60] sm:$0xff] }
  0x1e   : > { %2680 = vmatpush3.msra.mxu0 %v253_v7  ;;  %3059 = vmatprep.subr.mxu1 %v253_v7  ;;  %v631_v41 = vld [vmem:[%s4124_s2 + $0x30] sm:$0xff]  ;;  %v246_v43 = vld [vmem:[%s3452_s13 + $0xd8] sm:$0xff]  ;;  %v630_v44 = vld [vmem:[%s4124_s2 + $0x28] sm:$0xff] }
  0x1f   : > { %2681 = vmatprep.subr.mxu0 %v252_v8  ;;  %3068 = vmatpush3.msra.mxu1 %v253_v7  ;;  %v247_v45 = vld [vmem:[%s3452_s13 + $0xe0] sm:$0xff]  ;;  %v232_v46 = vld [vmem:[%s3452_s13 + $0x68] sm:$0xff]  ;;  %v233_v48 = vld [vmem:[%s3452_s13 + $0x70] sm:$0xff] }
  0x20   : > { %2682 = vmatpush3.msra.mxu0 %v252_v8  ;;  %3060 = vmatprep.subr.mxu1 %v252_v8  ;;  %v629_v47 = vld [vmem:[%s4124_s2 + $0x20] sm:$0xff]  ;;  %v248_v49 = vld [vmem:[%s3452_s13 + $0xe8] sm:$0xff]  ;;  %v628_v50 = vld [vmem:[%s4124_s2 + $0x18] sm:$0xff] }
  0x21   : > { %2683 = vmatprep.subr.mxu0 %v251_v9  ;;  %3069 = vmatpush3.msra.mxu1 %v252_v8  ;;  %v249_v51 = vld [vmem:[%s3452_s13 + $0xf0] sm:$0xff]  ;;  %v234_v52 = vld [vmem:[%s3452_s13 + $0x78] sm:$0xff]  ;;  %v626_v55 = vld [vmem:[%s4124_s2 + $0x8] sm:$0xff] }
  0x22   : > { %2684 = vmatpush3.msra.mxu0 %v251_v9  ;;  %3061 = vmatprep.subr.mxu1 %v251_v9  ;;  %v250_v53 = vld [vmem:[%s3452_s13 + $0xf8] sm:$0xff]  ;;  %v627_v54 = vld [vmem:[%s4124_s2 + $0x10] sm:$0xff]  ;;  %v625_v56 = vld [vmem:[%s4124_s2] sm:$0xff] }
  0x23   : > { %2686 = vmatmul.mubr.msk.f32.vlgmr.msra.gmra.mxu0 %vm267_vm1, %v220_v10  ;;  %3070 = vmatpush3.msra.mxu1 %v251_v9  ;;  %v2343_v57 = vld [vmem:[%s4124_s2 + $0xf8] sm:$0xff]  ;;  %v2342_v58 = vld [vmem:[%s4124_s2 + $0xf0] sm:$0xff]  ;;  %v2341_v59 = vld [vmem:[%s4124_s2 + $0xe8] sm:$0xff] }
  0x24   : > { %2688 = vmatprep.mubr.msk.f32.mxu0 %vm267_vm1, %v221_v11  ;;  %2709 = vmatprep.mubr.msk.f32.mxu1 %vm267_vm1, %v235_v12  ;;  %v2340_v60 = vld [vmem:[%s4124_s2 + $0xe0] sm:$0xff]  ;;  %v2339_v61 = vld [vmem:[%s4124_s2 + $0xd8] sm:$0xff]  ;;  %v2338_v62 = vld [vmem:[%s4124_s2 + $0xd0] sm:$0xff] }
  0x25   : > { %2710 = vmatmul.mubr.msk.f32.vlgmr.msra.gmra.mxu1 %vm267_vm1, %v236_v13  ;;  %2733 = vmatprep.subr.mxu1 %v640_v14  ;;  %v2337_v63 = vld [vmem:[%s4124_s2 + $0xc8] sm:$0xff]  ;;  %v2336_v0 = vld [vmem:[%s4124_s2 + $0xc0] sm:$0xff]  ;;  %v2335_v1 = vld [vmem:[%s4124_s2 + $0xb8] sm:$0xff] }
  0x26   : > { %2712 = vmatprep.mubr.msk.f32.mxu1 %vm267_vm1, %v237_v15  ;;  %2734 = vmatpush3.msra.mxu1 %v640_v14  ;;  %v2334_v2 = vld [vmem:[%s4124_s2 + $0xb0] sm:$0xff]  ;;  %v2333_v3 = vld [vmem:[%s4124_s2 + $0xa8] sm:$0xff]  ;;  %v2332_v4 = vld [vmem:[%s4124_s2 + $0xa0] sm:$0xff] }
  0x27   : > { %2689 = vmatmul.mubr.msk.f32.gmra.mxu0 %vm267_vm1, %v222_v16  ;;  %2735 = vmatprep.subr.mxu1 %v639_v17  ;;  %v2331_v5 = vld [vmem:[%s4124_s2 + $0x98] sm:$0xff]  ;;  %v3620_v6 = vld [vmem:[%s4125_s3] ss:$0 sm:$0xff] }
  0x28   : > { %2691 = vmatprep.mubr.msk.f32.mxu0 %vm267_vm1, %v223_v18  ;;  %2736 = vmatpush3.msra.mxu1 %v639_v17 }
  0x29   : > { %2713 = vmatmul.mubr.msk.f32.gmra.mxu1 %vm267_vm1, %v238_v19  ;;  %2737 = vmatprep.subr.mxu1 %v638_v20 }
  0x2a   : > { %2715 = vmatprep.mubr.msk.f32.mxu1 %vm267_vm1, %v239_v21  ;;  %2738 = vmatpush3.msra.mxu1 %v638_v20 }
  0x2b   : > { %2692 = vmatmul.mubr.msk.f32.gmra.mxu0 %vm267_vm1, %v224_v22  ;;  %2739 = vmatprep.subr.mxu1 %v637_v23 }
  0x2c   : > { %2694 = vmatprep.mubr.msk.f32.mxu0 %vm267_vm1, %v225_v24  ;;  %2740 = vmatpush3.msra.mxu1 %v637_v23 }
  0x2d   : > { %2716 = vmatmul.mubr.msk.f32.gmra.mxu1 %vm267_vm1, %v240_v25  ;;  %2741 = vmatprep.subr.mxu1 %v636_v26 }
  0x2e   : > { %2718 = vmatprep.mubr.msk.f32.mxu1 %vm267_vm1, %v241_v27  ;;  %2742 = vmatpush3.msra.mxu1 %v636_v26 }
  0x2f   : > { %2695 = vmatmul.mubr.msk.f32.gmra.mxu0 %vm267_vm1, %v226_v28  ;;  %2743 = vmatprep.subr.mxu1 %v635_v29 }
  0x30   : > { %2697 = vmatprep.mubr.msk.f32.mxu0 %vm267_vm1, %v227_v30  ;;  %2744 = vmatpush3.msra.mxu1 %v635_v29 }
  0x31   : > { %2719 = vmatmul.mubr.msk.f32.gmra.mxu1 %vm267_vm1, %v242_v31  ;;  %2745 = vmatprep.subr.mxu1 %v634_v32 }
  0x32   : > { %2721 = vmatprep.mubr.msk.f32.mxu1 %vm267_vm1, %v243_v33  ;;  %2746 = vmatpush3.msra.mxu1 %v634_v32 }
  0x33   : > { %2698 = vmatmul.mubr.msk.f32.gmra.mxu0 %vm267_vm1, %v228_v34  ;;  %2747 = vmatprep.subr.mxu1 %v633_v35 }
  0x34   : > { %2700 = vmatprep.mubr.msk.f32.mxu0 %vm267_vm1, %v229_v36  ;;  %2748 = vmatpush3.msra.mxu1 %v633_v35 }
  0x35   : > { %2722 = vmatmul.mubr.msk.f32.gmra.mxu1 %vm267_vm1, %v244_v37  ;;  %2749 = vmatprep.subr.mxu1 %v632_v38 }
  0x36   : > { %2724 = vmatprep.mubr.msk.f32.mxu1 %vm267_vm1, %v245_v39  ;;  %2750 = vmatpush3.msra.mxu1 %v632_v38 }
  0x37   : > { %2701 = vmatmul.mubr.msk.f32.gmra.mxu0 %vm267_vm1, %v230_v40  ;;  %2751 = vmatprep.subr.mxu1 %v631_v41 }
  0x38   : > { %2703 = vmatprep.mubr.msk.f32.mxu0 %vm267_vm1, %v231_v42  ;;  %2752 = vmatpush3.msra.mxu1 %v631_v41 }
  0x39   : > { %2725 = vmatmul.mubr.msk.f32.gmra.mxu1 %vm267_vm1, %v246_v43  ;;  %2753 = vmatprep.subr.mxu1 %v630_v44 }
  0x3a   : > { %2727 = vmatprep.mubr.msk.f32.mxu1 %vm267_vm1, %v247_v45  ;;  %2754 = vmatpush3.msra.mxu1 %v630_v44 }
  0x3b   : > { %2704 = vmatmul.mubr.msk.f32.gmra.mxu0 %vm267_vm1, %v232_v46  ;;  %2755 = vmatprep.subr.mxu1 %v629_v47 }
  0x3c   : > { %2706 = vmatprep.mubr.msk.f32.mxu0 %vm267_vm1, %v233_v48  ;;  %2756 = vmatpush3.msra.mxu1 %v629_v47 }
  0x3d   : > { %2728 = vmatmul.mubr.msk.f32.gmra.mxu1 %vm267_vm1, %v248_v49  ;;  %2757 = vmatprep.subr.mxu1 %v628_v50 }
  0x3e   : > { %2730 = vmatprep.mubr.msk.f32.mxu1 %vm267_vm1, %v249_v51  ;;  %2758 = vmatpush3.msra.mxu1 %v628_v50 }
  0x3f   : > { %2707 = vmatmul.mubr.msk.f32.gmra.mxu0 %vm267_vm1, %v234_v52  ;;  %2759 = vmatprep.subr.mxu1 %v627_v54 }
  0x40   : > { %2760 = vmatpush3.msra.mxu1 %v627_v54  ;;  %2813 = vmatprep.subr.mxu0 %v2343_v57 }
  0x41   : > { %2731 = vmatmul.mubr.msk.f32.gmra.mxu1 %vm267_vm1, %v250_v53  ;;  %2761 = vmatprep.subr.mxu1 %v626_v55 }
  0x42   : > { %2762 = vmatpush3.msra.mxu1 %v626_v55  ;;  %2814 = vmatpush3.msra.mxu0 %v2343_v57 }
  0x43   : > { %2763 = vmatprep.subr.mxu1 %v625_v56  ;;  %2815 = vmatprep.subr.mxu0 %v2342_v58 }
  0x44   : > { %2764 = vmatpush3.msra.mxu1 %v625_v56  ;;  %2816 = vmatpush3.msra.mxu0 %v2342_v58 }
  0x45   : > { %2817 = vmatprep.subr.mxu0 %v2341_v59 }
  0x46   : > { %2818 = vmatpush3.msra.mxu0 %v2341_v59 }
  0x47   : > { %2819 = vmatprep.subr.mxu0 %v2340_v60 }
  0x48   : > { %2820 = vmatpush3.msra.mxu0 %v2340_v60 }
  0x49   : > { %2821 = vmatprep.subr.mxu0 %v2339_v61 }
  0x4a   : > { %2822 = vmatpush3.msra.mxu0 %v2339_v61 }
  0x4b   : > { %2823 = vmatprep.subr.mxu0 %v2338_v62 }
  0x4c   : > { %2824 = vmatpush3.msra.mxu0 %v2338_v62 }
  0x4d   : > { %2825 = vmatprep.subr.mxu0 %v2337_v63 }
  0x4e   : > { %2826 = vmatpush3.msra.mxu0 %v2337_v63 }
  0x4f   : > { %2827 = vmatprep.subr.mxu0 %v2336_v0 }
  0x50   : > { %2828 = vmatpush3.msra.mxu0 %v2336_v0 }
  0x51   : > { %2829 = vmatprep.subr.mxu0 %v2335_v1 }
  0x52   : > { %2830 = vmatpush3.msra.mxu0 %v2335_v1 }
  0x53   : > { %2831 = vmatprep.subr.mxu0 %v2334_v2 }
  0x54   : > { %2832 = vmatpush3.msra.mxu0 %v2334_v2 }
  0x55   : > { %2833 = vmatprep.subr.mxu0 %v2333_v3 }
  0x56   : > { %2834 = vmatpush3.msra.mxu0 %v2333_v3 }
  0x57   : > { %2835 = vmatprep.subr.mxu0 %v2332_v4 }
  0x58   : > { %2836 = vmatpush3.msra.mxu0 %v2332_v4 }
  0x59   : > { %2837 = vmatprep.subr.mxu0 %v2331_v5 }
  0x5a   : > { %2838 = vmatpush3.msra.mxu0 %v2331_v5 }
  0xe3   : > { %v2687_v7 = vpop.f32.mrf.mxu0 }
  0xe4   : > { %v440_v8 = vadd.f32 %v2687_v7, %v3620_v6 }
  0xe5   : > { %v434_v9 = vpop.f32.mrf.mxu0  ;;  %v3623_v10 = vpop.f32.mrf.mxu1 }
  0xe6   : > { %v435_v11 = vadd.f32 %v3620_v6, %v434_v9  ;;  %v594_v15 = vmax.f32 %v440_v8, 0.0  ;;  %v520_v4 = vadd.f32 %v3623_v10, %v3620_v6 }
  0xe7   : > { %v2690_v12 = vpop.f32.mrf.mxu0  ;;  %v514_v13 = vpop.f32.mrf.mxu1 }
  0xe8   : > { %v593_v14 = vmax.f32 %v435_v11, 0.0  ;;  %v450_v16 = vadd.f32 %v2690_v12, %v3620_v6  ;;  %v515_v58 = vadd.f32 %v3620_v6, %v514_v13  ;;  %v610_v9 = vmax.f32 %v520_v4, 0.0 }
  0xe9   : > { %v444_v17 = vpop.f32.mrf.mxu0  ;;  %v3627_v18 = vpop.f32.mrf.mxu1 }
  0xea   : > { %v445_v19 = vadd.f32 %v3620_v6, %v444_v17  ;;  %2765 = vmatprep.mubr.f32.mxu1 %v593_v14  ;;  %v596_v23 = vmax.f32 %v450_v16, 0.0  ;;  %v609_v1 = vmax.f32 %v515_v58, 0.0  ;;  %v530_v11 = vadd.f32 %v3627_v18, %v3620_v6 }
  0xeb   : > { %v2693_v20 = vpop.f32.mrf.mxu0  ;;  %2766 = vmatmul.mubr.f32.vlgmr.msra.gmra.mxu1 %v594_v15  ;;  %v524_v21 = vpop.f32.mrf.mxu1 }
  0xec   : > { %v595_v22 = vmax.f32 %v445_v19, 0.0  ;;  %v460_v24 = vadd.f32 %v2693_v20, %v3620_v6  ;;  %v525_v2 = vadd.f32 %v3620_v6, %v524_v21  ;;  %v612_v15 = vmax.f32 %v530_v11, 0.0 }
  0xed   : > { %v454_v25 = vpop.f32.mrf.mxu0  ;;  %v3631_v26 = vpop.f32.mrf.mxu1 }
  0xee   : > { %v455_v27 = vadd.f32 %v3620_v6, %v454_v25  ;;  %2768 = vmatprep.mubr.f32.mxu1 %v595_v22  ;;  %v598_v30 = vmax.f32 %v460_v24, 0.0  ;;  %v611_v7 = vmax.f32 %v525_v2, 0.0  ;;  %v540_v10 = vadd.f32 %v3631_v26, %v3620_v6 }
  0xef   : > { %v2696_v28 = vpop.f32.mrf.mxu0  ;;  %2769 = vmatmul.mubr.f32.gmra.mxu1 %v596_v23  ;;  %v534_v33 = vpop.f32.mrf.mxu1 }
  0xf0   : > { %v597_v29 = vmax.f32 %v455_v27, 0.0  ;;  %v470_v31 = vadd.f32 %v2696_v28, %v3620_v6  ;;  %v535_v8 = vadd.f32 %v3620_v6, %v534_v33  ;;  %v614_v20 = vmax.f32 %v540_v10, 0.0 }
  0xf1   : > { %v464_v32 = vpop.f32.mrf.mxu0  ;;  %v2720_v40 = vpop.f32.mrf.mxu1 }
  0xf2   : > { %v465_v34 = vadd.f32 %v3620_v6, %v464_v32  ;;  %2771 = vmatprep.mubr.f32.mxu1 %v597_v29  ;;  %v600_v37 = vmax.f32 %v470_v31, 0.0  ;;  %v613_v13 = vmax.f32 %v535_v8, 0.0  ;;  %v550_v21 = vadd.f32 %v2720_v40, %v3620_v6  ;;  %v2330_v40 = vld [vmem:[%s4124_s2 + $0x90] sm:$0xff] }
  0xf3   : > { %v2699_v35 = vpop.f32.mrf.mxu0  ;;  %2772 = vmatmul.mubr.f32.gmra.mxu1 %v598_v30  ;;  %v544_v47 = vpop.f32.mrf.mxu1  ;;  %2839 = vmatprep.subr.mxu0 %v2330_v40 }
  0xf4   : > { %v599_v36 = vmax.f32 %v465_v34, 0.0  ;;  %v480_v38 = vadd.f32 %v2699_v35, %v3620_v6  ;;  %v545_v14 = vadd.f32 %v3620_v6, %v544_v47  ;;  %v616_v24 = vmax.f32 %v550_v21, 0.0  ;;  %2840 = vmatpush3.msra.mxu0 %v2330_v40  ;;  %v2356_v47 = vld [vmem:[%s4124_s2 + $0x150] sm:$0xff] }
  0xf5   : > { %v474_v39 = vpop.f32.mrf.mxu0  ;;  %v2723_v54 = vpop.f32.mrf.mxu1 }
  0xf6   : > { %v475_v41 = vadd.f32 %v3620_v6, %v474_v39  ;;  %2774 = vmatprep.mubr.f32.mxu1 %v599_v36  ;;  %v602_v44 = vmax.f32 %v480_v38, 0.0  ;;  %v615_v17 = vmax.f32 %v545_v14, 0.0  ;;  %v560_v25 = vadd.f32 %v2723_v54, %v3620_v6  ;;  %v2349_v54 = vld [vmem:[%s4124_s2 + $0x118] sm:$0xff] }
  0xf7   : > { %v2702_v42 = vpop.f32.mrf.mxu0  ;;  %2775 = vmatmul.mubr.f32.gmra.mxu1 %v600_v37  ;;  %v554_v62 = vpop.f32.mrf.mxu1 }
  0xf8   : > { %v601_v43 = vmax.f32 %v475_v41, 0.0  ;;  %v490_v45 = vadd.f32 %v2702_v42, %v3620_v6  ;;  %v555_v19 = vadd.f32 %v3620_v6, %v554_v62  ;;  %v618_v29 = vmax.f32 %v560_v25, 0.0  ;;  %v2329_v41 = vld [vmem:[%s4124_s2 + $0x88] sm:$0xff]  ;;  %v2361_v42 = vld [vmem:[%s4124_s2 + $0x178] sm:$0xff] }
  0xf9   : > { %v484_v46 = vpop.f32.mrf.mxu0  ;;  %v2726_v5 = vpop.f32.mrf.mxu1  ;;  %2841 = vmatprep.subr.mxu0 %v2329_v41  ;;  %2893 = vmatprep.subr.mxu1 %v2361_v42 }
  0xfa   : > { %v485_v48 = vadd.f32 %v3620_v6, %v484_v46  ;;  %2777 = vmatprep.mubr.f32.mxu1 %v601_v43  ;;  %v604_v51 = vmax.f32 %v490_v45, 0.0  ;;  %v617_v22 = vmax.f32 %v555_v19, 0.0  ;;  %v570_v30 = vadd.f32 %v2726_v5, %v3620_v6  ;;  %2842 = vmatpush3.msra.mxu0 %v2329_v41  ;;  %v2360_v43 = vld [vmem:[%s4124_s2 + $0x170] sm:$0xff]  ;;  %v2358_v45 = vld [vmem:[%s4124_s2 + $0x160] sm:$0xff]  ;;  %v2357_v46 = vld [vmem:[%s4124_s2 + $0x158] sm:$0xff] }
  0xfb   : > { %v2705_v49 = vpop.f32.mrf.mxu0  ;;  %2778 = vmatmul.mubr.f32.gmra.mxu1 %v602_v44  ;;  %v564_v12 = vpop.f32.mrf.mxu1  ;;  %v2359_v44 = vld [vmem:[%s4124_s2 + $0x168] sm:$0xff] }
  0xfc   : > { %v603_v50 = vmax.f32 %v485_v48, 0.0  ;;  %v500_v52 = vadd.f32 %v2705_v49, %v3620_v6  ;;  %v565_v23 = vadd.f32 %v3620_v6, %v564_v12  ;;  %v620_v34 = vmax.f32 %v570_v30, 0.0  ;;  %2894 = vmatpush3.msra.mxu1 %v2361_v42  ;;  %v2355_v48 = vld [vmem:[%s4124_s2 + $0x148] sm:$0xff]  ;;  %v2354_v49 = vld [vmem:[%s4124_s2 + $0x140] sm:$0xff] }
  0xfd   : > { %v494_v53 = vpop.f32.mrf.mxu0  ;;  %v2729_v16 = vpop.f32.mrf.mxu1  ;;  %2895 = vmatprep.subr.mxu1 %v2360_v43 }
  0xfe   : > { %v495_v55 = vadd.f32 %v3620_v6, %v494_v53  ;;  %2780 = vmatprep.mubr.f32.mxu1 %v603_v50  ;;  %v606_v59 = vmax.f32 %v500_v52, 0.0  ;;  %v619_v26 = vmax.f32 %v565_v23, 0.0  ;;  %v580_v35 = vadd.f32 %v2729_v16, %v3620_v6  ;;  %2896 = vmatpush3.msra.mxu1 %v2360_v43  ;;  %v2353_v50 = vld [vmem:[%s4124_s2 + $0x138] sm:$0xff]  ;;  %v2351_v52 = vld [vmem:[%s4124_s2 + $0x128] sm:$0xff]  ;;  %v2350_v53 = vld [vmem:[%s4124_s2 + $0x120] sm:$0xff] }
  0xff   : > { %v2708_v56 = vpop.f32.mrf.mxu0  ;;  %2781 = vmatmul.mubr.f32.gmra.mxu1 %v604_v51  ;;  %v574_v18 = vpop.f32.mrf.mxu1  ;;  %2897 = vmatprep.subr.mxu1 %v2359_v44  ;;  %v2352_v51 = vld [vmem:[%s4124_s2 + $0x130] sm:$0xff] }
 0x100   : > { %v605_v57 = vmax.f32 %v495_v55, 0.0  ;;  %v510_v60 = vadd.f32 %v2708_v56, %v3620_v6  ;;  %v575_v28 = vadd.f32 %v3620_v6, %v574_v18  ;;  %v622_v37 = vmax.f32 %v580_v35, 0.0  ;;  %2898 = vmatpush3.msra.mxu1 %v2359_v44  ;;  %v2348_v55 = vld [vmem:[%s4124_s2 + $0x110] sm:$0xff]  ;;  %v2347_v56 = vld [vmem:[%s4124_s2 + $0x108] sm:$0xff] }
 0x101   : > { %v504_v61 = vpop.f32.mrf.mxu0  ;;  %v2732_v27 = vpop.f32.mrf.mxu1  ;;  %2899 = vmatprep.subr.mxu1 %v2358_v45 }
 0x102   : > { %v505_v63 = vadd.f32 %v3620_v6, %v504_v61  ;;  %2783 = vmatprep.mubr.f32.mxu1 %v605_v57  ;;  %v608_v3 = vmax.f32 %v510_v60, 0.0  ;;  %v621_v32 = vmax.f32 %v575_v28, 0.0  ;;  %v590_v38 = vadd.f32 %v2732_v27, %v3620_v6  ;;  %2900 = vmatpush3.msra.mxu1 %v2358_v45  ;;  %v3720_v57 = vld [vmem:[%s4125_s3 + $0x1] ss:$0 sm:$0xff] }
 0x103   : > { %2784 = vmatmul.mubr.f32.gmra.mxu1 %v606_v59  ;;  %v584_v31 = vpop.f32.mrf.mxu1  ;;  %2901 = vmatprep.subr.mxu1 %v2357_v46 }
 0x104   : > { %v607_v0 = vmax.f32 %v505_v63, 0.0  ;;  %v585_v33 = vadd.f32 %v3620_v6, %v584_v31  ;;  %v624_v39 = vmax.f32 %v590_v38, 0.0  ;;  %v2328_v6 = vld [vmem:[%s4124_s2 + $0x80] sm:$0xff]  ;;  %2902 = vmatpush3.msra.mxu1 %v2357_v46 }
 0x105   : > { %2843 = vmatprep.subr.mxu0 %v2328_v6  ;;  %2903 = vmatprep.subr.mxu1 %v2356_v47 }
 0x106   : > { %2786 = vmatprep.mubr.f32.mxu1 %v607_v0  ;;  %v623_v36 = vmax.f32 %v585_v33, 0.0  ;;  %2844 = vmatpush3.msra.mxu0 %v2328_v6 }
 0x107   : > { %2787 = vmatmul.mubr.f32.gmra.mxu1 %v608_v3 }
 0x108   : > { %2789 = vmatprep.mubr.f32.mxu1 %v609_v1  ;;  %2904 = vmatpush3.msra.mxu1 %v2356_v47 }
 0x109   : > { %2905 = vmatprep.subr.mxu1 %v2355_v48 }
 0x10a   : > { %2906 = vmatpush3.msra.mxu1 %v2355_v48 }
 0x10b   : > { %2790 = vmatmul.mubr.f32.gmra.mxu1 %v610_v9  ;;  %2907 = vmatprep.subr.mxu1 %v2354_v49 }
 0x10c   : > { %2792 = vmatprep.mubr.f32.mxu1 %v611_v7  ;;  %2908 = vmatpush3.msra.mxu1 %v2354_v49 }
 0x10d   : > { %2909 = vmatprep.subr.mxu1 %v2353_v50 }
 0x10e   : > { %2910 = vmatpush3.msra.mxu1 %v2353_v50 }
 0x10f   : > { %2793 = vmatmul.mubr.f32.gmra.mxu1 %v612_v15  ;;  %2911 = vmatprep.subr.mxu1 %v2352_v51 }
 0x110   : > { %2795 = vmatprep.mubr.f32.mxu1 %v613_v13  ;;  %2912 = vmatpush3.msra.mxu1 %v2352_v51 }
 0x111   : > { %2913 = vmatprep.subr.mxu1 %v2351_v52 }
 0x112   : > { %2914 = vmatpush3.msra.mxu1 %v2351_v52 }
 0x113   : > { %2796 = vmatmul.mubr.f32.gmra.mxu1 %v614_v20  ;;  %2915 = vmatprep.subr.mxu1 %v2350_v53 }
 0x114   : > { %2798 = vmatprep.mubr.f32.mxu1 %v615_v17  ;;  %2916 = vmatpush3.msra.mxu1 %v2350_v53 }
 0x115   : > { %2917 = vmatprep.subr.mxu1 %v2349_v54 }
 0x116   : > { %2918 = vmatpush3.msra.mxu1 %v2349_v54 }
 0x117   : > { %2799 = vmatmul.mubr.f32.gmra.mxu1 %v616_v24  ;;  %2919 = vmatprep.subr.mxu1 %v2348_v55 }
 0x118   : > { %2801 = vmatprep.mubr.f32.mxu1 %v617_v22  ;;  %2920 = vmatpush3.msra.mxu1 %v2348_v55 }
 0x119   : > { %2921 = vmatprep.subr.mxu1 %v2347_v56 }
 0x11a   : > { %2922 = vmatpush3.msra.mxu1 %v2347_v56 }
 0x11b   : > { %2802 = vmatmul.mubr.f32.gmra.mxu1 %v618_v29 }
 0x11c   : > { %2804 = vmatprep.mubr.f32.mxu1 %v619_v26 }
 0x11f   : > { %2805 = vmatmul.mubr.f32.gmra.mxu1 %v620_v34 }
 0x120   : > { %2807 = vmatprep.mubr.f32.mxu1 %v621_v32 }
 0x123   : > { %2808 = vmatmul.mubr.f32.gmra.mxu1 %v622_v37 }
 0x124   : > { %2810 = vmatprep.mubr.f32.mxu1 %v623_v36 }
 0x127   : > { %2811 = vmatmul.mubr.f32.gmra.mxu1 %v624_v39 }
 0x1ab   : > { %v2767_v58 = vpop.f32.mrf.mxu1 }
 0x1ac   : > { %v721_v59 = vadd.f32 %v2767_v58, %v3720_v57 }
 0x1ad   : > { %v715_v60 = vpop.f32.mrf.mxu1 }
 0x1ae   : > { %v716_v61 = vadd.f32 %v3720_v57, %v715_v60  ;;  %v875_v0 = vmax.f32 %v721_v59, 0.0 }
 0x1af   : > { %v2770_v62 = vpop.f32.mrf.mxu1 }
 0x1b0   : > { %v874_v63 = vmax.f32 %v716_v61, 0.0  ;;  %v731_v1 = vadd.f32 %v2770_v62, %v3720_v57 }
 0x1b1   : > { %v725_v2 = vpop.f32.mrf.mxu1 }
 0x1b2   : > { %v726_v3 = vadd.f32 %v3720_v57, %v725_v2  ;;  %2845 = vmatprep.mubr.f32.mxu0 %v874_v63  ;;  %v877_v7 = vmax.f32 %v731_v1, 0.0 }
 0x1b3   : > { %v2773_v4 = vpop.f32.mrf.mxu1  ;;  %2846 = vmatmul.mubr.f32.vlgmr.msra.gmra.mxu0 %v875_v0 }
 0x1b4   : > { %v876_v5 = vmax.f32 %v726_v3, 0.0  ;;  %v741_v8 = vadd.f32 %v2773_v4, %v3720_v57 }
 0x1b5   : > { %v735_v9 = vpop.f32.mrf.mxu1 }
 0x1b6   : > { %v736_v11 = vadd.f32 %v3720_v57, %v735_v9  ;;  %2848 = vmatprep.mubr.f32.mxu0 %v876_v5  ;;  %v879_v14 = vmax.f32 %v741_v8, 0.0 }
 0x1b7   : > { %v2776_v12 = vpop.f32.mrf.mxu1  ;;  %2849 = vmatmul.mubr.f32.gmra.mxu0 %v877_v7 }
 0x1b8   : > { %v878_v13 = vmax.f32 %v736_v11, 0.0  ;;  %v751_v15 = vadd.f32 %v2776_v12, %v3720_v57 }
 0x1b9   : > { %v745_v10 = vpop.f32.mrf.mxu1 }
 0x1ba   : > { %v746_v16 = vadd.f32 %v3720_v57, %v745_v10  ;;  %2851 = vmatprep.mubr.f32.mxu0 %v878_v13  ;;  %v881_v20 = vmax.f32 %v751_v15, 0.0 }
 0x1bb   : > { %v2779_v17 = vpop.f32.mrf.mxu1  ;;  %2852 = vmatmul.mubr.f32.gmra.mxu0 %v879_v14 }
 0x1bc   : > { %v880_v19 = vmax.f32 %v746_v16, 0.0  ;;  %v761_v21 = vadd.f32 %v2779_v17, %v3720_v57 }
 0x1bd   : > { %v755_v18 = vpop.f32.mrf.mxu1 }
 0x1be   : > { %v756_v22 = vadd.f32 %v3720_v57, %v755_v18  ;;  %2854 = vmatprep.mubr.f32.mxu0 %v880_v19  ;;  %v883_v25 = vmax.f32 %v761_v21, 0.0 }
 0x1bf   : > { %v2782_v23 = vpop.f32.mrf.mxu1  ;;  %2855 = vmatmul.mubr.f32.gmra.mxu0 %v881_v20 }
 0x1c0   : > { %v882_v24 = vmax.f32 %v756_v22, 0.0  ;;  %v771_v27 = vadd.f32 %v2782_v23, %v3720_v57 }
 0x1c1   : > { %v765_v26 = vpop.f32.mrf.mxu1 }
 0x1c2   : > { %v766_v28 = vadd.f32 %v3720_v57, %v765_v26  ;;  %2857 = vmatprep.mubr.f32.mxu0 %v882_v24  ;;  %v885_v31 = vmax.f32 %v771_v27, 0.0 }
 0x1c3   : > { %v2785_v29 = vpop.f32.mrf.mxu1  ;;  %2858 = vmatmul.mubr.f32.gmra.mxu0 %v883_v25 }
 0x1c4   : > { %v884_v30 = vmax.f32 %v766_v28, 0.0  ;;  %v781_v32 = vadd.f32 %v2785_v29, %v3720_v57  ;;  %v2346_v28 = vld [vmem:[%s4124_s2 + $0x100] sm:$0xff]  ;;  %v2379_v29 = vld [vmem:[%s4124_s2 + $0x1f8] sm:$0xff] }
 0x1c5   : > { %v775_v33 = vpop.f32.mrf.mxu1  ;;  %2923 = vmatprep.subr.mxu1 %v2346_v28  ;;  %2973 = vmatprep.subr.mxu0 %v2379_v29 }
 0x1c6   : > { %v776_v34 = vadd.f32 %v3720_v57, %v775_v33  ;;  %2860 = vmatprep.mubr.f32.mxu0 %v884_v30  ;;  %v887_v37 = vmax.f32 %v781_v32, 0.0  ;;  %2924 = vmatpush3.msra.mxu1 %v2346_v28  ;;  %v2377_v30 = vld [vmem:[%s4124_s2 + $0x1e8] sm:$0xff]  ;;  %v2375_v32 = vld [vmem:[%s4124_s2 + $0x1d8] sm:$0xff]  ;;  %v2374_v33 = vld [vmem:[%s4124_s2 + $0x1d0] sm:$0xff] }
 0x1c7   : > { %v2788_v35 = vpop.f32.mrf.mxu1  ;;  %2861 = vmatmul.mubr.f32.gmra.mxu0 %v885_v31  ;;  %v2376_v31 = vld [vmem:[%s4124_s2 + $0x1e0] sm:$0xff] }
 0x1c8   : > { %v886_v36 = vmax.f32 %v776_v34, 0.0  ;;  %v791_v38 = vadd.f32 %v2788_v35, %v3720_v57  ;;  %2974 = vmatpush3.msra.mxu0 %v2379_v29  ;;  %v2373_v34 = vld [vmem:[%s4124_s2 + $0x1c8] sm:$0xff]  ;;  %v2372_v35 = vld [vmem:[%s4124_s2 + $0x1c0] sm:$0xff] }
 0x1c9   : > { %v785_v39 = vpop.f32.mrf.mxu1 }
 0x1ca   : > { %v786_v40 = vadd.f32 %v3720_v57, %v785_v39  ;;  %2863 = vmatprep.mubr.f32.mxu0 %v886_v36  ;;  %v889_v42 = vmax.f32 %v791_v38, 0.0  ;;  %v2371_v36 = vld [vmem:[%s4124_s2 + $0x1b8] sm:$0xff]  ;;  %v2369_v38 = vld [vmem:[%s4124_s2 + $0x1a8] sm:$0xff]  ;;  %v2368_v39 = vld [vmem:[%s4124_s2 + $0x1a0] sm:$0xff] }
 0x1cb   : > { %v2791_v41 = vpop.f32.mrf.mxu1  ;;  %2864 = vmatmul.mubr.f32.gmra.mxu0 %v887_v37  ;;  %v2370_v37 = vld [vmem:[%s4124_s2 + $0x1b0] sm:$0xff] }
 0x1cc   : > { %v888_v6 = vmax.f32 %v786_v40, 0.0  ;;  %v801_v43 = vadd.f32 %v2791_v41, %v3720_v57  ;;  %v2367_v40 = vld [vmem:[%s4124_s2 + $0x198] sm:$0xff]  ;;  %v2366_v41 = vld [vmem:[%s4124_s2 + $0x190] sm:$0xff] }
 0x1cd   : > { %v795_v44 = vpop.f32.mrf.mxu1 }
 0x1ce   : > { %v796_v45 = vadd.f32 %v3720_v57, %v795_v44  ;;  %2866 = vmatprep.mubr.f32.mxu0 %v888_v6  ;;  %v891_v48 = vmax.f32 %v801_v43, 0.0  ;;  %v2365_v6 = vld [vmem:[%s4124_s2 + $0x188] sm:$0xff] }
 0x1cf   : > { %v2794_v46 = vpop.f32.mrf.mxu1  ;;  %2867 = vmatmul.mubr.f32.gmra.mxu0 %v889_v42  ;;  %v3805_v42 = vld [vmem:[%s4125_s3 + $0x2] ss:$0 sm:$0xff] }
 0x1d0   : > { %v890_v47 = vmax.f32 %v796_v45, 0.0  ;;  %v811_v49 = vadd.f32 %v2794_v46, %v3720_v57 }
 0x1d1   : > { %v805_v50 = vpop.f32.mrf.mxu1 }
 0x1d2   : > { %v806_v51 = vadd.f32 %v3720_v57, %v805_v50  ;;  %2869 = vmatprep.mubr.f32.mxu0 %v890_v47  ;;  %v893_v54 = vmax.f32 %v811_v49, 0.0 }
 0x1d3   : > { %v2797_v52 = vpop.f32.mrf.mxu1  ;;  %2870 = vmatmul.mubr.f32.gmra.mxu0 %v891_v48 }
 0x1d4   : > { %v892_v53 = vmax.f32 %v806_v51, 0.0  ;;  %v821_v55 = vadd.f32 %v2797_v52, %v3720_v57 }
 0x1d5   : > { %v815_v56 = vpop.f32.mrf.mxu1 }
 0x1d6   : > { %v816_v58 = vadd.f32 %v3720_v57, %v815_v56  ;;  %2872 = vmatprep.mubr.f32.mxu0 %v892_v53  ;;  %v895_v61 = vmax.f32 %v821_v55, 0.0 }
 0x1d7   : > { %v2800_v59 = vpop.f32.mrf.mxu1  ;;  %2873 = vmatmul.mubr.f32.gmra.mxu0 %v893_v54 }
 0x1d8   : > { %v894_v60 = vmax.f32 %v816_v58, 0.0  ;;  %v831_v62 = vadd.f32 %v2800_v59, %v3720_v57 }
 0x1d9   : > { %v825_v63 = vpop.f32.mrf.mxu1 }
 0x1da   : > { %v826_v0 = vadd.f32 %v3720_v57, %v825_v63  ;;  %2875 = vmatprep.mubr.f32.mxu0 %v894_v60  ;;  %v897_v3 = vmax.f32 %v831_v62, 0.0 }
 0x1db   : > { %v2803_v1 = vpop.f32.mrf.mxu1  ;;  %2876 = vmatmul.mubr.f32.gmra.mxu0 %v895_v61 }
 0x1dc   : > { %v896_v2 = vmax.f32 %v826_v0, 0.0  ;;  %v841_v4 = vadd.f32 %v2803_v1, %v3720_v57 }
 0x1dd   : > { %v835_v5 = vpop.f32.mrf.mxu1 }
 0x1de   : > { %v836_v7 = vadd.f32 %v3720_v57, %v835_v5  ;;  %2878 = vmatprep.mubr.f32.mxu0 %v896_v2  ;;  %v899_v11 = vmax.f32 %v841_v4, 0.0 }
 0x1df   : > { %v2806_v8 = vpop.f32.mrf.mxu1  ;;  %2879 = vmatmul.mubr.f32.gmra.mxu0 %v897_v3 }
 0x1e0   : > { %v898_v9 = vmax.f32 %v836_v7, 0.0  ;;  %v851_v12 = vadd.f32 %v2806_v8, %v3720_v57 }
 0x1e1   : > { %v845_v13 = vpop.f32.mrf.mxu1 }
 0x1e2   : > { %v846_v14 = vadd.f32 %v3720_v57, %v845_v13  ;;  %2881 = vmatprep.mubr.f32.mxu0 %v898_v9  ;;  %v901_v16 = vmax.f32 %v851_v12, 0.0 }
 0x1e3   : > { %v2809_v15 = vpop.f32.mrf.mxu1  ;;  %2882 = vmatmul.mubr.f32.gmra.mxu0 %v899_v11 }
 0x1e4   : > { %v900_v10 = vmax.f32 %v846_v14, 0.0  ;;  %v861_v17 = vadd.f32 %v2809_v15, %v3720_v57 }
 0x1e5   : > { %v855_v19 = vpop.f32.mrf.mxu1 }
 0x1e6   : > { %v856_v20 = vadd.f32 %v3720_v57, %v855_v19  ;;  %2884 = vmatprep.mubr.f32.mxu0 %v900_v10  ;;  %v903_v22 = vmax.f32 %v861_v17, 0.0 }
 0x1e7   : > { %v2812_v21 = vpop.f32.mrf.mxu1  ;;  %2885 = vmatmul.mubr.f32.gmra.mxu0 %v901_v16 }
 0x1e8   : > { %v902_v18 = vmax.f32 %v856_v20, 0.0  ;;  %v871_v23 = vadd.f32 %v2812_v21, %v3720_v57 }
 0x1e9   : > { %v865_v24 = vpop.f32.mrf.mxu1 }
 0x1ea   : > { %v866_v25 = vadd.f32 %v3720_v57, %v865_v24  ;;  %2887 = vmatprep.mubr.f32.mxu0 %v902_v18  ;;  %v905_v26 = vmax.f32 %v871_v23, 0.0  ;;  %v2378_v57 = vld [vmem:[%s4124_s2 + $0x1f0] sm:$0xff] }
 0x1eb   : > { %2888 = vmatmul.mubr.f32.gmra.mxu0 %v903_v22  ;;  %2975 = vmatprep.subr.mxu0 %v2378_v57 }
 0x1ec   : > { %v904_v27 = vmax.f32 %v866_v25, 0.0  ;;  %2976 = vmatpush3.msra.mxu0 %v2378_v57 }
 0x1ed   : > { %2977 = vmatprep.subr.mxu0 %v2377_v30 }
 0x1ee   : > { %2890 = vmatprep.mubr.f32.mxu0 %v904_v27  ;;  %2978 = vmatpush3.msra.mxu0 %v2377_v30 }
 0x1ef   : > { %2891 = vmatmul.mubr.f32.gmra.mxu0 %v905_v26  ;;  %2979 = vmatprep.subr.mxu0 %v2376_v31 }
 0x1f0   : > { %2980 = vmatpush3.msra.mxu0 %v2376_v31 }
 0x1f1   : > { %2981 = vmatprep.subr.mxu0 %v2375_v32 }
 0x1f2   : > { %2982 = vmatpush3.msra.mxu0 %v2375_v32 }
 0x1f3   : > { %2983 = vmatprep.subr.mxu0 %v2374_v33 }
 0x1f4   : > { %2984 = vmatpush3.msra.mxu0 %v2374_v33 }
 0x1f5   : > { %2985 = vmatprep.subr.mxu0 %v2373_v34 }
 0x1f6   : > { %2986 = vmatpush3.msra.mxu0 %v2373_v34 }
 0x1f7   : > { %2987 = vmatprep.subr.mxu0 %v2372_v35 }
 0x1f8   : > { %2988 = vmatpush3.msra.mxu0 %v2372_v35 }
 0x1f9   : > { %2989 = vmatprep.subr.mxu0 %v2371_v36 }
 0x1fa   : > { %2990 = vmatpush3.msra.mxu0 %v2371_v36 }
 0x1fb   : > { %2991 = vmatprep.subr.mxu0 %v2370_v37 }
 0x1fc   : > { %2992 = vmatpush3.msra.mxu0 %v2370_v37 }
 0x1fd   : > { %2993 = vmatprep.subr.mxu0 %v2369_v38 }
 0x1fe   : > { %2994 = vmatpush3.msra.mxu0 %v2369_v38 }
 0x1ff   : > { %2995 = vmatprep.subr.mxu0 %v2368_v39 }
 0x200   : > { %2996 = vmatpush3.msra.mxu0 %v2368_v39 }
 0x201   : > { %2997 = vmatprep.subr.mxu0 %v2367_v40 }
 0x202   : > { %2998 = vmatpush3.msra.mxu0 %v2367_v40 }
 0x203   : > { %2999 = vmatprep.subr.mxu0 %v2366_v41 }
 0x204   : > { %3000 = vmatpush3.msra.mxu0 %v2366_v41 }
 0x205   : > { %3001 = vmatprep.subr.mxu0 %v2365_v6 }
 0x206   : > { %3002 = vmatpush3.msra.mxu0 %v2365_v6 }
 0x273   : > { %v2847_v43 = vpop.f32.mrf.mxu0 }
 0x274   : > { %v1003_v44 = vadd.f32 %v2847_v43, %v3805_v42 }
 0x275   : > { %v997_v45 = vpop.f32.mrf.mxu0 }
 0x276   : > { %v998_v46 = vadd.f32 %v3805_v42, %v997_v45  ;;  %v1157_v49 = vmax.f32 %v1003_v44, 0.0 }
 0x277   : > { %v2850_v47 = vpop.f32.mrf.mxu0 }
 0x278   : > { %v1156_v48 = vmax.f32 %v998_v46, 0.0  ;;  %v1013_v50 = vadd.f32 %v2850_v47, %v3805_v42 }
 0x279   : > { %v1007_v51 = vpop.f32.mrf.mxu0 }
 0x27a   : > { %v1008_v52 = vadd.f32 %v3805_v42, %v1007_v51  ;;  %2925 = vmatprep.mubr.f32.mxu1 %v1156_v48  ;;  %v1159_v55 = vmax.f32 %v1013_v50, 0.0 }
 0x27b   : > { %v2853_v53 = vpop.f32.mrf.mxu0  ;;  %2926 = vmatmul.mubr.f32.vlgmr.msra.gmra.mxu1 %v1157_v49 }
 0x27c   : > { %v1158_v54 = vmax.f32 %v1008_v52, 0.0  ;;  %v1023_v56 = vadd.f32 %v2853_v53, %v3805_v42 }
 0x27d   : > { %v1017_v58 = vpop.f32.mrf.mxu0 }
 0x27e   : > { %v1018_v59 = vadd.f32 %v3805_v42, %v1017_v58  ;;  %2928 = vmatprep.mubr.f32.mxu1 %v1158_v54  ;;  %v1161_v62 = vmax.f32 %v1023_v56, 0.0 }
 0x27f   : > { %v2856_v60 = vpop.f32.mrf.mxu0  ;;  %2929 = vmatmul.mubr.f32.gmra.mxu1 %v1159_v55 }
 0x280   : > { %v1160_v61 = vmax.f32 %v1018_v59, 0.0  ;;  %v1033_v63 = vadd.f32 %v2856_v60, %v3805_v42 }
 0x281   : > { %v1027_v0 = vpop.f32.mrf.mxu0 }
 0x282   : > { %v1028_v1 = vadd.f32 %v3805_v42, %v1027_v0  ;;  %2931 = vmatprep.mubr.f32.mxu1 %v1160_v61  ;;  %v1163_v4 = vmax.f32 %v1033_v63, 0.0 }
 0x283   : > { %v2859_v2 = vpop.f32.mrf.mxu0  ;;  %2932 = vmatmul.mubr.f32.gmra.mxu1 %v1161_v62 }
 0x284   : > { %v1162_v3 = vmax.f32 %v1028_v1, 0.0  ;;  %v1043_v5 = vadd.f32 %v2859_v2, %v3805_v42 }
 0x285   : > { %v1037_v7 = vpop.f32.mrf.mxu0 }
 0x286   : > { %v1038_v8 = vadd.f32 %v3805_v42, %v1037_v7  ;;  %2934 = vmatprep.mubr.f32.mxu1 %v1162_v3  ;;  %v1165_v12 = vmax.f32 %v1043_v5, 0.0 }
 0x287   : > { %v2862_v9 = vpop.f32.mrf.mxu0  ;;  %2935 = vmatmul.mubr.f32.gmra.mxu1 %v1163_v4 }
 0x288   : > { %v1164_v11 = vmax.f32 %v1038_v8, 0.0  ;;  %v1053_v13 = vadd.f32 %v2862_v9, %v3805_v42 }
 0x289   : > { %v1047_v14 = vpop.f32.mrf.mxu0 }
 0x28a   : > { %v1048_v15 = vadd.f32 %v3805_v42, %v1047_v14  ;;  %2937 = vmatprep.mubr.f32.mxu1 %v1164_v11  ;;  %v1167_v17 = vmax.f32 %v1053_v13, 0.0 }
 0x28b   : > { %v2865_v10 = vpop.f32.mrf.mxu0  ;;  %2938 = vmatmul.mubr.f32.gmra.mxu1 %v1165_v12 }
 0x28c   : > { %v1166_v16 = vmax.f32 %v1048_v15, 0.0  ;;  %v1063_v19 = vadd.f32 %v2865_v10, %v3805_v42  ;;  %v2364_v15 = vld [vmem:[%s4124_s2 + $0x180] sm:$0xff] }
 0x28d   : > { %v1057_v20 = vpop.f32.mrf.mxu0  ;;  %3003 = vmatprep.subr.mxu0 %v2364_v15  ;;  %v3845_v10 = vld [vmem:[%s4125_s3 + $0x3] ss:$0 sm:$0xff] }
 0x28e   : > { %v1058_v21 = vadd.f32 %v3805_v42, %v1057_v20  ;;  %2940 = vmatprep.mubr.f32.mxu1 %v1166_v16  ;;  %v1169_v23 = vmax.f32 %v1063_v19, 0.0  ;;  %3004 = vmatpush3.msra.mxu0 %v2364_v15 }
 0x28f   : > { %v2868_v18 = vpop.f32.mrf.mxu0  ;;  %2941 = vmatmul.mubr.f32.gmra.mxu1 %v1167_v17 }
 0x290   : > { %v1168_v22 = vmax.f32 %v1058_v21, 0.0  ;;  %v1073_v24 = vadd.f32 %v2868_v18, %v3805_v42 }
 0x291   : > { %v1067_v25 = vpop.f32.mrf.mxu0 }
 0x292   : > { %v1068_v27 = vadd.f32 %v3805_v42, %v1067_v25  ;;  %2943 = vmatprep.mubr.f32.mxu1 %v1168_v22  ;;  %v1171_v29 = vmax.f32 %v1073_v24, 0.0 }
 0x293   : > { %v2871_v26 = vpop.f32.mrf.mxu0  ;;  %2944 = vmatmul.mubr.f32.gmra.mxu1 %v1169_v23 }
 0x294   : > { %v1170_v28 = vmax.f32 %v1068_v27, 0.0  ;;  %v1083_v57 = vadd.f32 %v2871_v26, %v3805_v42 }
 0x295   : > { %v1077_v30 = vpop.f32.mrf.mxu0 }
 0x296   : > { %v1078_v31 = vadd.f32 %v3805_v42, %v1077_v30  ;;  %2946 = vmatprep.mubr.f32.mxu1 %v1170_v28  ;;  %v1173_v34 = vmax.f32 %v1083_v57, 0.0 }
 0x297   : > { %v2874_v32 = vpop.f32.mrf.mxu0  ;;  %2947 = vmatmul.mubr.f32.gmra.mxu1 %v1171_v29 }
 0x298   : > { %v1172_v33 = vmax.f32 %v1078_v31, 0.0  ;;  %v1093_v35 = vadd.f32 %v2874_v32, %v3805_v42 }
 0x299   : > { %v1087_v36 = vpop.f32.mrf.mxu0 }
 0x29a   : > { %v1088_v37 = vadd.f32 %v3805_v42, %v1087_v36  ;;  %2949 = vmatprep.mubr.f32.mxu1 %v1172_v33  ;;  %v1175_v40 = vmax.f32 %v1093_v35, 0.0 }
 0x29b   : > { %v2877_v38 = vpop.f32.mrf.mxu0  ;;  %2950 = vmatmul.mubr.f32.gmra.mxu1 %v1173_v34 }
 0x29c   : > { %v1174_v39 = vmax.f32 %v1088_v37, 0.0  ;;  %v1103_v41 = vadd.f32 %v2877_v38, %v3805_v42 }
 0x29d   : > { %v1097_v6 = vpop.f32.mrf.mxu0 }
 0x29e   : > { %v1098_v43 = vadd.f32 %v3805_v42, %v1097_v6  ;;  %2952 = vmatprep.mubr.f32.mxu1 %v1174_v39  ;;  %v1177_v46 = vmax.f32 %v1103_v41, 0.0 }
 0x29f   : > { %v2880_v44 = vpop.f32.mrf.mxu0  ;;  %2953 = vmatmul.mubr.f32.gmra.mxu1 %v1175_v40 }
 0x2a0   : > { %v1176_v45 = vmax.f32 %v1098_v43, 0.0  ;;  %v1113_v47 = vadd.f32 %v2880_v44, %v3805_v42 }
 0x2a1   : > { %v1107_v48 = vpop.f32.mrf.mxu0 }
 0x2a2   : > { %v1108_v49 = vadd.f32 %v3805_v42, %v1107_v48  ;;  %2955 = vmatprep.mubr.f32.mxu1 %v1176_v45  ;;  %v1179_v52 = vmax.f32 %v1113_v47, 0.0 }
 0x2a3   : > { %v2883_v50 = vpop.f32.mrf.mxu0  ;;  %2956 = vmatmul.mubr.f32.gmra.mxu1 %v1177_v46 }
 0x2a4   : > { %v1178_v51 = vmax.f32 %v1108_v49, 0.0  ;;  %v1123_v53 = vadd.f32 %v2883_v50, %v3805_v42 }
 0x2a5   : > { %v1117_v54 = vpop.f32.mrf.mxu0 }
 0x2a6   : > { %v1118_v55 = vadd.f32 %v3805_v42, %v1117_v54  ;;  %2958 = vmatprep.mubr.f32.mxu1 %v1178_v51  ;;  %v1181_v59 = vmax.f32 %v1123_v53, 0.0 }
 0x2a7   : > { %v2886_v56 = vpop.f32.mrf.mxu0  ;;  %2959 = vmatmul.mubr.f32.gmra.mxu1 %v1179_v52 }
 0x2a8   : > { %v1180_v58 = vmax.f32 %v1118_v55, 0.0  ;;  %v1133_v60 = vadd.f32 %v2886_v56, %v3805_v42 }
 0x2a9   : > { %v1127_v61 = vpop.f32.mrf.mxu0 }
 0x2aa   : > { %v1128_v62 = vadd.f32 %v3805_v42, %v1127_v61  ;;  %2961 = vmatprep.mubr.f32.mxu1 %v1180_v58  ;;  %v1183_v1 = vmax.f32 %v1133_v60, 0.0 }
 0x2ab   : > { %v2889_v63 = vpop.f32.mrf.mxu0  ;;  %2962 = vmatmul.mubr.f32.gmra.mxu1 %v1181_v59 }
 0x2ac   : > { %v1182_v0 = vmax.f32 %v1128_v62, 0.0  ;;  %v1143_v2 = vadd.f32 %v2889_v63, %v3805_v42 }
 0x2ad   : > { %v1137_v3 = vpop.f32.mrf.mxu0 }
 0x2ae   : > { %v1138_v4 = vadd.f32 %v3805_v42, %v1137_v3  ;;  %2964 = vmatprep.mubr.f32.mxu1 %v1182_v0  ;;  %v1185_v8 = vmax.f32 %v1143_v2, 0.0 }
 0x2af   : > { %v2892_v5 = vpop.f32.mrf.mxu0  ;;  %2965 = vmatmul.mubr.f32.gmra.mxu1 %v1183_v1 }
 0x2b0   : > { %v1184_v7 = vmax.f32 %v1138_v4, 0.0  ;;  %v1153_v9 = vadd.f32 %v2892_v5, %v3805_v42 }
 0x2b1   : > { %v1147_v11 = vpop.f32.mrf.mxu0 }
 0x2b2   : > { %v1148_v12 = vadd.f32 %v3805_v42, %v1147_v11  ;;  %2967 = vmatprep.mubr.f32.mxu1 %v1184_v7  ;;  %v1187_v14 = vmax.f32 %v1153_v9, 0.0 }
 0x2b3   : > { %2968 = vmatmul.mubr.f32.gmra.mxu1 %v1185_v8 }
 0x2b4   : > { %v1186_v13 = vmax.f32 %v1148_v12, 0.0 }
 0x2b6   : > { %2970 = vmatprep.mubr.f32.mxu1 %v1186_v13 }
 0x2b7   : > { %2971 = vmatmul.mubr.f32.gmra.mxu1 %v1187_v14 }
 0x33b   : > { %v2927_v16 = vpop.f32.mrf.mxu1 }
 0x33c   : > { %v1285_v42 = vadd.f32 %v2927_v16, %v3845_v10 }
 0x33d   : > { %v1279_v17 = vpop.f32.mrf.mxu1 }
 0x33e   : > { %v1280_v19 = vadd.f32 %v3845_v10, %v1279_v17  ;;  %v1439_v18 = vmax.f32 %v1285_v42, 0.0 }
 0x33f   : > { %v2930_v20 = vpop.f32.mrf.mxu1 }
 0x340   : > { %v1438_v21 = vmax.f32 %v1280_v19, 0.0  ;;  %v1295_v22 = vadd.f32 %v2930_v20, %v3845_v10 }
 0x341   : > { %v1289_v23 = vpop.f32.mrf.mxu1 }
 0x342   : > { %v1290_v24 = vadd.f32 %v3845_v10, %v1289_v23  ;;  %3005 = vmatprep.mubr.f32.mxu0 %v1438_v21  ;;  %v1441_v26 = vmax.f32 %v1295_v22, 0.0 }
 0x343   : > { %v2933_v25 = vpop.f32.mrf.mxu1  ;;  %3006 = vmatmul.mubr.f32.vlgmr.msra.gmra.mxu0 %v1439_v18 }
 0x344   : > { %v1440_v27 = vmax.f32 %v1290_v24, 0.0  ;;  %v1305_v28 = vadd.f32 %v2933_v25, %v3845_v10 }
 0x345   : > { %v1299_v29 = vpop.f32.mrf.mxu1 }
 0x346   : > { %v1300_v57 = vadd.f32 %v3845_v10, %v1299_v29  ;;  %3008 = vmatprep.mubr.f32.mxu0 %v1440_v27  ;;  %v1443_v32 = vmax.f32 %v1305_v28, 0.0 }
 0x347   : > { %v2936_v30 = vpop.f32.mrf.mxu1  ;;  %3009 = vmatmul.mubr.f32.gmra.mxu0 %v1441_v26 }
 0x348   : > { %v1442_v31 = vmax.f32 %v1300_v57, 0.0  ;;  %v1315_v33 = vadd.f32 %v2936_v30, %v3845_v10 }
 0x349   : > { %v1309_v34 = vpop.f32.mrf.mxu1 }
 0x34a   : > { %v1310_v35 = vadd.f32 %v3845_v10, %v1309_v34  ;;  %3011 = vmatprep.mubr.f32.mxu0 %v1442_v31  ;;  %v1445_v38 = vmax.f32 %v1315_v33, 0.0 }
 0x34b   : > { %v2939_v36 = vpop.f32.mrf.mxu1  ;;  %3012 = vmatmul.mubr.f32.gmra.mxu0 %v1443_v32 }
 0x34c   : > { %v1444_v37 = vmax.f32 %v1310_v35, 0.0  ;;  %v1325_v39 = vadd.f32 %v2939_v36, %v3845_v10 }
 0x34d   : > { %v1319_v40 = vpop.f32.mrf.mxu1 }
 0x34e   : > { %v1320_v41 = vadd.f32 %v3845_v10, %v1319_v40  ;;  %3014 = vmatprep.mubr.f32.mxu0 %v1444_v37  ;;  %v1447_v44 = vmax.f32 %v1325_v39, 0.0 }
 0x34f   : > { %v2942_v6 = vpop.f32.mrf.mxu1  ;;  %3015 = vmatmul.mubr.f32.gmra.mxu0 %v1445_v38 }
 0x350   : > { %v1446_v43 = vmax.f32 %v1320_v41, 0.0  ;;  %v1335_v45 = vadd.f32 %v2942_v6, %v3845_v10 }
 0x351   : > { %v1329_v46 = vpop.f32.mrf.mxu1 }
 0x352   : > { %v1330_v47 = vadd.f32 %v3845_v10, %v1329_v46  ;;  %3017 = vmatprep.mubr.f32.mxu0 %v1446_v43  ;;  %v1449_v50 = vmax.f32 %v1335_v45, 0.0 }
 0x353   : > { %v2945_v48 = vpop.f32.mrf.mxu1  ;;  %3018 = vmatmul.mubr.f32.gmra.mxu0 %v1447_v44 }
 0x354   : > { %v1448_v49 = vmax.f32 %v1330_v47, 0.0  ;;  %v1345_v51 = vadd.f32 %v2945_v48, %v3845_v10  ;;  %v3882_v47 = vld [vmem:[%s4125_s3 + $0x4] ss:$0 sm:$0xff] }
 0x355   : > { %v1339_v52 = vpop.f32.mrf.mxu1 }
 0x356   : > { %v1340_v53 = vadd.f32 %v3845_v10, %v1339_v52  ;;  %3020 = vmatprep.mubr.f32.mxu0 %v1448_v49  ;;  %v1451_v56 = vmax.f32 %v1345_v51, 0.0 }
 0x357   : > { %v2948_v54 = vpop.f32.mrf.mxu1  ;;  %3021 = vmatmul.mubr.f32.gmra.mxu0 %v1449_v50 }
 0x358   : > { %v1450_v55 = vmax.f32 %v1340_v53, 0.0  ;;  %v1355_v58 = vadd.f32 %v2948_v54, %v3845_v10 }
 0x359   : > { %v1349_v59 = vpop.f32.mrf.mxu1 }
 0x35a   : > { %v1350_v60 = vadd.f32 %v3845_v10, %v1349_v59  ;;  %3023 = vmatprep.mubr.f32.mxu0 %v1450_v55  ;;  %v1453_v63 = vmax.f32 %v1355_v58, 0.0 }
 0x35b   : > { %v2951_v61 = vpop.f32.mrf.mxu1  ;;  %3024 = vmatmul.mubr.f32.gmra.mxu0 %v1451_v56 }
 0x35c   : > { %v1452_v62 = vmax.f32 %v1350_v60, 0.0  ;;  %v1365_v0 = vadd.f32 %v2951_v61, %v3845_v10 }
 0x35d   : > { %v1359_v1 = vpop.f32.mrf.mxu1 }
 0x35e   : > { %v1360_v2 = vadd.f32 %v3845_v10, %v1359_v1  ;;  %3026 = vmatprep.mubr.f32.mxu0 %v1452_v62  ;;  %v1455_v5 = vmax.f32 %v1365_v0, 0.0 }
 0x35f   : > { %v2954_v3 = vpop.f32.mrf.mxu1  ;;  %3027 = vmatmul.mubr.f32.gmra.mxu0 %v1453_v63 }
 0x360   : > { %v1454_v4 = vmax.f32 %v1360_v2, 0.0  ;;  %v1375_v7 = vadd.f32 %v2954_v3, %v3845_v10 }
 0x361   : > { %v1369_v8 = vpop.f32.mrf.mxu1 }
 0x362   : > { %v1370_v9 = vadd.f32 %v3845_v10, %v1369_v8  ;;  %3029 = vmatprep.mubr.f32.mxu0 %v1454_v4  ;;  %v1457_v13 = vmax.f32 %v1375_v7, 0.0 }
 0x363   : > { %v2957_v11 = vpop.f32.mrf.mxu1  ;;  %3030 = vmatmul.mubr.f32.gmra.mxu0 %v1455_v5 }
 0x364   : > { %v1456_v12 = vmax.f32 %v1370_v9, 0.0  ;;  %v1385_v14 = vadd.f32 %v2957_v11, %v3845_v10 }
 0x365   : > { %v1379_v15 = vpop.f32.mrf.mxu1 }
 0x366   : > { %v1380_v16 = vadd.f32 %v3845_v10, %v1379_v15  ;;  %3032 = vmatprep.mubr.f32.mxu0 %v1456_v12  ;;  %v1459_v19 = vmax.f32 %v1385_v14, 0.0 }
 0x367   : > { %v2960_v42 = vpop.f32.mrf.mxu1  ;;  %3033 = vmatmul.mubr.f32.gmra.mxu0 %v1457_v13 }
 0x368   : > { %v1458_v17 = vmax.f32 %v1380_v16, 0.0  ;;  %v1395_v20 = vadd.f32 %v2960_v42, %v3845_v10 }
 0x369   : > { %v1389_v21 = vpop.f32.mrf.mxu1 }
 0x36a   : > { %v1390_v18 = vadd.f32 %v3845_v10, %v1389_v21  ;;  %3035 = vmatprep.mubr.f32.mxu0 %v1458_v17  ;;  %v1461_v24 = vmax.f32 %v1395_v20, 0.0 }
 0x36b   : > { %v2963_v22 = vpop.f32.mrf.mxu1  ;;  %3036 = vmatmul.mubr.f32.gmra.mxu0 %v1459_v19 }
 0x36c   : > { %v1460_v23 = vmax.f32 %v1390_v18, 0.0  ;;  %v1405_v25 = vadd.f32 %v2963_v22, %v3845_v10 }
 0x36d   : > { %v1399_v27 = vpop.f32.mrf.mxu1 }
 0x36e   : > { %v1400_v26 = vadd.f32 %v3845_v10, %v1399_v27  ;;  %3038 = vmatprep.mubr.f32.mxu0 %v1460_v23  ;;  %v1463_v57 = vmax.f32 %v1405_v25, 0.0 }
 0x36f   : > { %v2966_v28 = vpop.f32.mrf.mxu1  ;;  %3039 = vmatmul.mubr.f32.gmra.mxu0 %v1461_v24 }
 0x370   : > { %v1462_v29 = vmax.f32 %v1400_v26, 0.0  ;;  %v1415_v30 = vadd.f32 %v2966_v28, %v3845_v10 }
 0x371   : > { %v1409_v31 = vpop.f32.mrf.mxu1 }
 0x372   : > { %v1410_v32 = vadd.f32 %v3845_v10, %v1409_v31  ;;  %3041 = vmatprep.mubr.f32.mxu0 %v1462_v29  ;;  %v1465_v35 = vmax.f32 %v1415_v30, 0.0 }
 0x373   : > { %v2969_v33 = vpop.f32.mrf.mxu1  ;;  %3042 = vmatmul.mubr.f32.gmra.mxu0 %v1463_v57 }
 0x374   : > { %v1464_v34 = vmax.f32 %v1410_v32, 0.0  ;;  %v1425_v36 = vadd.f32 %v2969_v33, %v3845_v10 }
 0x375   : > { %v1419_v37 = vpop.f32.mrf.mxu1 }
 0x376   : > { %v1420_v38 = vadd.f32 %v3845_v10, %v1419_v37  ;;  %3044 = vmatprep.mubr.f32.mxu0 %v1464_v34  ;;  %v1467_v41 = vmax.f32 %v1425_v36, 0.0 }
 0x377   : > { %v2972_v39 = vpop.f32.mrf.mxu1  ;;  %3045 = vmatmul.mubr.f32.gmra.mxu0 %v1465_v35 }
 0x378   : > { %v1466_v40 = vmax.f32 %v1420_v38, 0.0  ;;  %v1435_v6 = vadd.f32 %v2972_v39, %v3845_v10 }
 0x379   : > { %v1429_v43 = vpop.f32.mrf.mxu1 }
 0x37a   : > { %v1430_v44 = vadd.f32 %v3845_v10, %v1429_v43  ;;  %3047 = vmatprep.mubr.f32.mxu0 %v1466_v40  ;;  %v1469_v46 = vmax.f32 %v1435_v6, 0.0 }
 0x37b   : > { %3048 = vmatmul.mubr.f32.gmra.mxu0 %v1467_v41 }
 0x37c   : > { %v1468_v45 = vmax.f32 %v1430_v44, 0.0 }
 0x37e   : > { %3050 = vmatprep.mubr.f32.mxu0 %v1468_v45 }
 0x37f   : > { %3051 = vmatmul.mubr.f32.gmra.mxu0 %v1469_v46 }
 0x403   : > { %v3007_v48 = vpop.f32.mrf.mxu0 }
 0x404   : > { %v1567_v49 = vadd.f32 %v3007_v48, %v3882_v47 }
 0x405   : > { %v1561_v50 = vpop.f32.mrf.mxu0 }
 0x406   : > { %v2383_v51 = vmul.f32 -1.442695, %v1567_v49  ;;  %v1562_v52 = vadd.f32 %v3882_v47, %v1561_v50 }
 0x407   : > { %v3010_v53 = vpop.f32.mrf.mxu0 }
 0x408   : > { %3159 = vpow2.f32 %v2383_v51  ;;  %v2382_v10 = vmul.f32 -1.442695, %v1562_v52  ;;  %v1577_v54 = vadd.f32 %v3010_v53, %v3882_v47 }
 0x409   : > { %v1571_v55 = vpop.f32.mrf.mxu0 }
 0x40a   : > { %3161 = vpow2.f32 %v2382_v10  ;;  %v2385_v56 = vmul.f32 -1.442695, %v1577_v54  ;;  %v1572_v58 = vadd.f32 %v3882_v47, %v1571_v55 }
 0x40b   : > { %v3013_v59 = vpop.f32.mrf.mxu0 }
 0x40c   : > { %3163 = vpow2.f32 %v2385_v56  ;;  %v2384_v60 = vmul.f32 -1.442695, %v1572_v58  ;;  %v1587_v61 = vadd.f32 %v3013_v59, %v3882_v47 }
 0x40d   : > { %v1581_v62 = vpop.f32.mrf.mxu0 }
 0x40e   : > { %3165 = vpow2.f32 %v2384_v60  ;;  %v2387_v63 = vmul.f32 -1.442695, %v1587_v61  ;;  %v1582_v0 = vadd.f32 %v3882_v47, %v1581_v62 }
 0x40f   : > { %v3016_v1 = vpop.f32.mrf.mxu0 }
 0x410   : > { %3167 = vpow2.f32 %v2387_v63  ;;  %v2386_v2 = vmul.f32 -1.442695, %v1582_v0  ;;  %v1597_v3 = vadd.f32 %v3016_v1, %v3882_v47 }
 0x411   : > { %v1591_v4 = vpop.f32.mrf.mxu0 }
 0x412   : > { %3169 = vpow2.f32 %v2386_v2  ;;  %v2389_v5 = vmul.f32 -1.442695, %v1597_v3  ;;  %v1592_v7 = vadd.f32 %v3882_v47, %v1591_v4 }
 0x413   : > { %v3019_v8 = vpop.f32.mrf.mxu0 }
 0x414   : > { %3171 = vpow2.f32 %v2389_v5  ;;  %v2388_v9 = vmul.f32 -1.442695, %v1592_v7  ;;  %v1607_v11 = vadd.f32 %v3019_v8, %v3882_v47 }
 0x415   : > { %v3160_v12 = vpop.eup %3159  ;;  %v1601_v13 = vpop.f32.mrf.mxu0 }
 0x416   : > { %v1817_v14 = vadd.f32 1.0, %v3160_v12  ;;  %3173 = vpow2.f32 %v2388_v9  ;;  %v2391_v15 = vmul.f32 -1.442695, %v1607_v11  ;;  %v1602_v16 = vadd.f32 %v3882_v47, %v1601_v13 }
 0x417   : > { %v3162_v42 = vpop.eup %3161  ;;  %v3022_v17 = vpop.f32.mrf.mxu0 }
 0x418   : > { %3175 = vrcp.f32 %v1817_v14  ;;  %v1816_v19 = vadd.f32 1.0, %v3162_v42  ;;  %v2390_v20 = vmul.f32 -1.442695, %v1602_v16  ;;  %v1617_v21 = vadd.f32 %v3022_v17, %v3882_v47 }
 0x419   : > { %v3164_v18 = vpop.eup %3163  ;;  %3177 = vpow2.f32 %v2391_v15  ;;  %v1611_v22 = vpop.f32.mrf.mxu0 }
 0x41a   : > { %3179 = vrcp.f32 %v1816_v19  ;;  %v1819_v23 = vadd.f32 1.0, %v3164_v18  ;;  %v2393_v24 = vmul.f32 -1.442695, %v1617_v21  ;;  %v1612_v25 = vadd.f32 %v3882_v47, %v1611_v22 }
 0x41b   : > { %v3166_v27 = vpop.eup %3165  ;;  %3181 = vpow2.f32 %v2390_v20  ;;  %v3025_v26 = vpop.f32.mrf.mxu0 }
 0x41c   : > { %3183 = vrcp.f32 %v1819_v23  ;;  %v1818_v28 = vadd.f32 1.0, %v3166_v27  ;;  %v2392_v29 = vmul.f32 -1.442695, %v1612_v25  ;;  %v1627_v57 = vadd.f32 %v3025_v26, %v3882_v47 }
 0x41d   : > { %v3168_v30 = vpop.eup %3167  ;;  %3185 = vpow2.f32 %v2393_v24  ;;  %v1621_v31 = vpop.f32.mrf.mxu0 }
 0x41e   : > { %3187 = vrcp.f32 %v1818_v28  ;;  %v1821_v32 = vadd.f32 1.0, %v3168_v30  ;;  %v2395_v33 = vmul.f32 -1.442695, %v1627_v57  ;;  %v1622_v34 = vadd.f32 %v3882_v47, %v1621_v31 }
 0x41f   : > { %v3170_v35 = vpop.eup %3169  ;;  %3189 = vpow2.f32 %v2392_v29  ;;  %v3028_v36 = vpop.f32.mrf.mxu0 }
 0x420   : > { %3191 = vrcp.f32 %v1821_v32  ;;  %v1820_v37 = vadd.f32 1.0, %v3170_v35  ;;  %v2394_v38 = vmul.f32 -1.442695, %v1622_v34  ;;  %v1637_v39 = vadd.f32 %v3028_v36, %v3882_v47 }
 0x421   : > { %v3172_v40 = vpop.eup %3171  ;;  %3193 = vpow2.f32 %v2395_v33  ;;  %v1631_v41 = vpop.f32.mrf.mxu0 }
 0x422   : > { %3195 = vrcp.f32 %v1820_v37  ;;  %v1823_v6 = vadd.f32 1.0, %v3172_v40  ;;  %v2397_v43 = vmul.f32 -1.442695, %v1637_v39  ;;  %v1632_v44 = vadd.f32 %v3882_v47, %v1631_v41 }
 0x423   : > { %v3174_v45 = vpop.eup %3173  ;;  %3197 = vpow2.f32 %v2394_v38  ;;  %v3031_v46 = vpop.f32.mrf.mxu0 }
 0x424   : > { %3199 = vrcp.f32 %v1823_v6  ;;  %v1822_v48 = vadd.f32 1.0, %v3174_v45  ;;  %v2396_v49 = vmul.f32 -1.442695, %v1632_v44  ;;  %v1647_v50 = vadd.f32 %v3031_v46, %v3882_v47 }
 0x425   : > { %v3176_v51 = vpop.eup %3175  ;;  %3201 = vpow2.f32 %v2397_v43  ;;  %v1641_v52 = vpop.f32.mrf.mxu0 }
 0x426   : > { %v3178_v53 = vpop.eup %3177  ;;  %1914 = vst.msk [vmem:[%s3902_s15 + $0x8] sm:$0xff] %vm1912_vm2, %v3176_v51  ;;  %3203 = vrcp.f32 %v1822_v48  ;;  %v2399_v10 = vmul.f32 -1.442695, %v1647_v50  ;;  %v1642_v54 = vadd.f32 %v3882_v47, %v1641_v52 }
 0x427   : > { %v3180_v55 = vpop.eup %3179  ;;  %v1825_v56 = vadd.f32 1.0, %v3178_v53  ;;  %3205 = vpow2.f32 %v2396_v49  ;;  %v3034_v58 = vpop.f32.mrf.mxu0 }
 0x428   : > { %v3182_v59 = vpop.eup %3181  ;;  %1913 = vst.msk [vmem:[%s3902_s15] sm:$0xff] %vm1912_vm2, %v3180_v55  ;;  %3207 = vpow2.f32 %v2399_v10  ;;  %v2398_v60 = vmul.f32 -1.442695, %v1642_v54  ;;  %v1657_v61 = vadd.f32 %v3034_v58, %v3882_v47 }
 0x429   : > { %v3184_v62 = vpop.eup %3183  ;;  %3209 = vrcp.f32 %v1825_v56  ;;  %v1824_v63 = vadd.f32 1.0, %v3182_v59  ;;  %v1651_v0 = vpop.f32.mrf.mxu0 }
 0x42a   : > { %v3186_v1 = vpop.eup %3185  ;;  %1916 = vst.msk [vmem:[%s3902_s15 + $0x18] sm:$0xff] %vm1912_vm2, %v3184_v62  ;;  %3211 = vpow2.f32 %v2398_v60  ;;  %v2401_v2 = vmul.f32 -1.442695, %v1657_v61  ;;  %v1652_v3 = vadd.f32 %v3882_v47, %v1651_v0 }
 0x42b   : > { %v3188_v4 = vpop.eup %3187  ;;  %3213 = vrcp.f32 %v1824_v63  ;;  %v1827_v5 = vadd.f32 1.0, %v3186_v1  ;;  %v3037_v7 = vpop.f32.mrf.mxu0 }
 0x42c   : > { %v3190_v8 = vpop.eup %3189  ;;  %1915 = vst.msk [vmem:[%s3902_s15 + $0x10] sm:$0xff] %vm1912_vm2, %v3188_v4  ;;  %3215 = vpow2.f32 %v2401_v2  ;;  %v2400_v9 = vmul.f32 -1.442695, %v1652_v3  ;;  %v1667_v11 = vadd.f32 %v3037_v7, %v3882_v47 }
 0x42d   : > { %v3192_v12 = vpop.eup %3191  ;;  %3217 = vrcp.f32 %v1827_v5  ;;  %v1826_v13 = vadd.f32 1.0, %v3190_v8  ;;  %v1661_v14 = vpop.f32.mrf.mxu0 }
 0x42e   : > { %v3194_v15 = vpop.eup %3193  ;;  %1918 = vst.msk [vmem:[%s3902_s15 + $0x28] sm:$0xff] %vm1912_vm2, %v3192_v12  ;;  %3219 = vpow2.f32 %v2400_v9  ;;  %v2403_v16 = vmul.f32 -1.442695, %v1667_v11  ;;  %v1662_v42 = vadd.f32 %v3882_v47, %v1661_v14 }
 0x42f   : > { %v3196_v17 = vpop.eup %3195  ;;  %3221 = vrcp.f32 %v1826_v13  ;;  %v1829_v19 = vadd.f32 1.0, %v3194_v15  ;;  %v3040_v20 = vpop.f32.mrf.mxu0 }
 0x430   : > { %v3198_v21 = vpop.eup %3197  ;;  %1917 = vst.msk [vmem:[%s3902_s15 + $0x20] sm:$0xff] %vm1912_vm2, %v3196_v17  ;;  %3223 = vpow2.f32 %v2403_v16  ;;  %v2402_v18 = vmul.f32 -1.442695, %v1662_v42  ;;  %v1677_v22 = vadd.f32 %v3040_v20, %v3882_v47 }
 0x431   : > { %v3200_v23 = vpop.eup %3199  ;;  %3225 = vrcp.f32 %v1829_v19  ;;  %v1828_v24 = vadd.f32 1.0, %v3198_v21  ;;  %v1671_v25 = vpop.f32.mrf.mxu0 }
 0x432   : > { %v3202_v27 = vpop.eup %3201  ;;  %1920 = vst.msk [vmem:[%s3902_s15 + $0x38] sm:$0xff] %vm1912_vm2, %v3200_v23  ;;  %3227 = vpow2.f32 %v2402_v18  ;;  %v2405_v26 = vmul.f32 -1.442695, %v1677_v22  ;;  %v1672_v28 = vadd.f32 %v3882_v47, %v1671_v25 }
 0x433   : > { %v3204_v29 = vpop.eup %3203  ;;  %3229 = vrcp.f32 %v1828_v24  ;;  %v1831_v57 = vadd.f32 1.0, %v3202_v27  ;;  %v3043_v30 = vpop.f32.mrf.mxu0 }
 0x434   : > { %v3206_v31 = vpop.eup %3205  ;;  %1919 = vst.msk [vmem:[%s3902_s15 + $0x30] sm:$0xff] %vm1912_vm2, %v3204_v29  ;;  %3231 = vpow2.f32 %v2405_v26  ;;  %v2404_v32 = vmul.f32 -1.442695, %v1672_v28  ;;  %v1687_v33 = vadd.f32 %v3043_v30, %v3882_v47 }
 0x435   : > { %v3208_v34 = vpop.eup %3207  ;;  %3233 = vrcp.f32 %v1831_v57  ;;  %v1830_v35 = vadd.f32 1.0, %v3206_v31  ;;  %v1681_v36 = vpop.f32.mrf.mxu0 }
 0x436   : > { %v3210_v37 = vpop.eup %3209  ;;  %v1833_v38 = vadd.f32 1.0, %v3208_v34  ;;  %3235 = vpow2.f32 %v2404_v32  ;;  %v2407_v39 = vmul.f32 -1.442695, %v1687_v33  ;;  %v1682_v40 = vadd.f32 %v3882_v47, %v1681_v36 }
 0x437   : > { %v3212_v41 = vpop.eup %3211  ;;  %1922 = vst.msk [vmem:[%s3902_s15 + $0x48] sm:$0xff] %vm1912_vm2, %v3210_v37  ;;  %3237 = vrcp.f32 %v1830_v35  ;;  %v3046_v6 = vpop.f32.mrf.mxu0 }
 0x438   : > { %v3214_v43 = vpop.eup %3213  ;;  %3239 = vrcp.f32 %v1833_v38  ;;  %v1832_v44 = vadd.f32 1.0, %v3212_v41  ;;  %v2406_v45 = vmul.f32 -1.442695, %v1682_v40  ;;  %v1697_v46 = vadd.f32 %v3046_v6, %v3882_v47 }
 0x439   : > { %v3216_v48 = vpop.eup %3215  ;;  %1921 = vst.msk [vmem:[%s3902_s15 + $0x40] sm:$0xff] %vm1912_vm2, %v3214_v43  ;;  %3241 = vpow2.f32 %v2407_v39  ;;  %v1691_v49 = vpop.f32.mrf.mxu0 }
 0x43a   : > { %v3218_v50 = vpop.eup %3217  ;;  %3243 = vrcp.f32 %v1832_v44  ;;  %v1835_v51 = vadd.f32 1.0, %v3216_v48  ;;  %v2409_v52 = vmul.f32 -1.442695, %v1697_v46  ;;  %v1692_v53 = vadd.f32 %v3882_v47, %v1691_v49 }
 0x43b   : > { %v3220_v10 = vpop.eup %3219  ;;  %1924 = vst.msk [vmem:[%s3902_s15 + $0x58] sm:$0xff] %vm1912_vm2, %v3218_v50  ;;  %3245 = vpow2.f32 %v2406_v45  ;;  %v3049_v54 = vpop.f32.mrf.mxu0 }
 0x43c   : > { %v3222_v55 = vpop.eup %3221  ;;  %3247 = vrcp.f32 %v1835_v51  ;;  %v1834_v56 = vadd.f32 1.0, %v3220_v10  ;;  %v2408_v58 = vmul.f32 -1.442695, %v1692_v53  ;;  %v1707_v59 = vadd.f32 %v3049_v54, %v3882_v47 }
 0x43d   : > { %v3224_v60 = vpop.eup %3223  ;;  %1923 = vst.msk [vmem:[%s3902_s15 + $0x50] sm:$0xff] %vm1912_vm2, %v3222_v55  ;;  %3249 = vpow2.f32 %v2409_v52  ;;  %v1701_v61 = vpop.f32.mrf.mxu0 }
 0x43e   : > { %v3226_v62 = vpop.eup %3225  ;;  %3251 = vrcp.f32 %v1834_v56  ;;  %v1837_v63 = vadd.f32 1.0, %v3224_v60  ;;  %v2411_v0 = vmul.f32 -1.442695, %v1707_v59  ;;  %v1702_v1 = vadd.f32 %v3882_v47, %v1701_v61 }
 0x43f   : > { %v3228_v2 = vpop.eup %3227  ;;  %1926 = vst.msk [vmem:[%s3902_s15 + $0x68] sm:$0xff] %vm1912_vm2, %v3226_v62  ;;  %3253 = vpow2.f32 %v2408_v58  ;;  %v3052_v3 = vpop.f32.mrf.mxu0 }
 0x440   : > { %v3230_v4 = vpop.eup %3229  ;;  %3255 = vrcp.f32 %v1837_v63  ;;  %v1836_v5 = vadd.f32 1.0, %v3228_v2  ;;  %v2410_v7 = vmul.f32 -1.442695, %v1702_v1  ;;  %v1717_v8 = vadd.f32 %v3052_v3, %v3882_v47 }
 0x441   : > { %v3232_v9 = vpop.eup %3231  ;;  %1925 = vst.msk [vmem:[%s3902_s15 + $0x60] sm:$0xff] %vm1912_vm2, %v3230_v4  ;;  %3257 = vpow2.f32 %v2411_v0  ;;  %v1711_v11 = vpop.f32.mrf.mxu0 }
 0x442   : > { %v3234_v12 = vpop.eup %3233  ;;  %3259 = vrcp.f32 %v1836_v5  ;;  %v1839_v13 = vadd.f32 1.0, %v3232_v9  ;;  %v2413_v14 = vmul.f32 -1.442695, %v1717_v8  ;;  %v1712_v15 = vadd.f32 %v3882_v47, %v1711_v11 }
 0x443   : > { %v3236_v16 = vpop.eup %3235  ;;  %1928 = vst.msk [vmem:[%s3902_s15 + $0x78] sm:$0xff] %vm1912_vm2, %v3234_v12  ;;  %3261 = vpow2.f32 %v2410_v7 }
 0x444   : > { %v3238_v42 = vpop.eup %3237  ;;  %3263 = vrcp.f32 %v1839_v13  ;;  %v1838_v17 = vadd.f32 1.0, %v3236_v16  ;;  %v2412_v19 = vmul.f32 -1.442695, %v1712_v15 }
 0x445   : > { %v3240_v20 = vpop.eup %3239  ;;  %1927 = vst.msk [vmem:[%s3902_s15 + $0x70] sm:$0xff] %vm1912_vm2, %v3238_v42  ;;  %3265 = vpow2.f32 %v2413_v14 }
 0x446   : > { %v3242_v21 = vpop.eup %3241  ;;  %1930 = vst.msk [vmem:[%s3902_s15 + $0x88] sm:$0xff] %vm1912_vm2, %v3240_v20  ;;  %3267 = vrcp.f32 %v1838_v17 }
 0x447   : > { %v3244_v47 = vpop.eup %3243  ;;  %v1841_v18 = vadd.f32 1.0, %v3242_v21  ;;  %3269 = vpow2.f32 %v2412_v19 }
 0x448   : > { %v3246_v22 = vpop.eup %3245  ;;  %1929 = vst.msk [vmem:[%s3902_s15 + $0x80] sm:$0xff] %vm1912_vm2, %v3244_v47 }
 0x449   : > { %v3248_v23 = vpop.eup %3247  ;;  %3271 = vrcp.f32 %v1841_v18  ;;  %v1840_v24 = vadd.f32 1.0, %v3246_v22 }
 0x44a   : > { %v3250_v25 = vpop.eup %3249  ;;  %1932 = vst.msk [vmem:[%s3902_s15 + $0x98] sm:$0xff] %vm1912_vm2, %v3248_v23 }
 0x44b   : > { %v3252_v27 = vpop.eup %3251  ;;  %3273 = vrcp.f32 %v1840_v24  ;;  %v1843_v26 = vadd.f32 1.0, %v3250_v25 }
 0x44c   : > { %v3254_v28 = vpop.eup %3253  ;;  %1931 = vst.msk [vmem:[%s3902_s15 + $0x90] sm:$0xff] %vm1912_vm2, %v3252_v27 }
 0x44d   : > { %v3256_v29 = vpop.eup %3255  ;;  %3275 = vrcp.f32 %v1843_v26  ;;  %v1842_v57 = vadd.f32 1.0, %v3254_v28 }
 0x44e   : > { %v3258_v30 = vpop.eup %3257  ;;  %1934 = vst.msk [vmem:[%s3902_s15 + $0xa8] sm:$0xff] %vm1912_vm2, %v3256_v29 }
 0x44f   : > { %v3260_v31 = vpop.eup %3259  ;;  %3277 = vrcp.f32 %v1842_v57  ;;  %v1845_v32 = vadd.f32 1.0, %v3258_v30 }
 0x450   : > { %v3262_v33 = vpop.eup %3261  ;;  %1933 = vst.msk [vmem:[%s3902_s15 + $0xa0] sm:$0xff] %vm1912_vm2, %v3260_v31 }
 0x451   : > { %v3264_v34 = vpop.eup %3263  ;;  %3279 = vrcp.f32 %v1845_v32  ;;  %v1844_v35 = vadd.f32 1.0, %v3262_v33 }
 0x452   : > { %v3266_v36 = vpop.eup %3265  ;;  %1936 = vst.msk [vmem:[%s3902_s15 + $0xb8] sm:$0xff] %vm1912_vm2, %v3264_v34 }
 0x453   : > { %v3268_v37 = vpop.eup %3267  ;;  %3281 = vrcp.f32 %v1844_v35  ;;  %v1847_v38 = vadd.f32 1.0, %v3266_v36 }
 0x454   : > { %v3270_v39 = vpop.eup %3269  ;;  %1935 = vst.msk [vmem:[%s3902_s15 + $0xb0] sm:$0xff] %vm1912_vm2, %v3268_v37 }
 0x455   : > { %3283 = vrcp.f32 %v1847_v38  ;;  %v1846_v40 = vadd.f32 1.0, %v3270_v39 }
 0x456   : > { %v3272_v41 = vpop.eup %3271 }
 0x457   : > { %1938 = vst.msk [vmem:[%s3902_s15 + $0xc8] sm:$0xff] %vm1912_vm2, %v3272_v41  ;;  %3285 = vrcp.f32 %v1846_v40 }
 0x458   : > { %v3274_v6 = vpop.eup %3273 }
 0x459   : > { %1937 = vst.msk [vmem:[%s3902_s15 + $0xc0] sm:$0xff] %vm1912_vm2, %v3274_v6 }
 0x45a   : > { %v3276_v43 = vpop.eup %3275 }
 0x45b   : > { %1940 = vst.msk [vmem:[%s3902_s15 + $0xd8] sm:$0xff] %vm1912_vm2, %v3276_v43 }
 0x45c   : > { %v3278_v44 = vpop.eup %3277 }
 0x45d   : > { %1939 = vst.msk [vmem:[%s3902_s15 + $0xd0] sm:$0xff] %vm1912_vm2, %v3278_v44 }
 0x45e   : > { %v3280_v45 = vpop.eup %3279 }
 0x45f   : > { %1942 = vst.msk [vmem:[%s3902_s15 + $0xe8] sm:$0xff] %vm1912_vm2, %v3280_v45 }
 0x460   : > { %v3282_v46 = vpop.eup %3281 }
 0x461   : > { %1941 = vst.msk [vmem:[%s3902_s15 + $0xe0] sm:$0xff] %vm1912_vm2, %v3282_v46  ;;  %1951 = sbr.rel (!%p3425_p4) target bundleno = 1174 (0x496), region = 40 }
 0x462   : > { %v3284_v48 = vpop.eup %3283 }
 0x463   : > { %1944 = vst.msk [vmem:[%s3902_s15 + $0xf8] sm:$0xff] %vm1912_vm2, %v3284_v48 }
 0x464   : > { %v3286_v49 = vpop.eup %3285 }
 0x465   : > { %1943 = vst.msk [vmem:[%s3902_s15 + $0xf0] sm:$0xff] %vm1912_vm2, %v3286_v49 }
 0x466   : > { %s4137_s11 = smov (!%p1954_p8, %s1953_s11), 32 }
 0x467   : > { %s2416_s21 = sshll.u32 %s4137_s11, 7 }
 0x468   : > { %p2419_p9 = scmp.eq.s32.totalorder %s2416_s21, 0 }
 0x469   : > { %s3996_s13 = sshrl.u32 (!%p2419_p9), %s4137_s11, 5 }
 0x46a   : > { %1962 = sbr.rel (%p2419_p9) target bundleno = 1174 (0x496), region = 44  ;;  %p2420_p10 = scmp.le.s32.totalorder (!%p2419_p9), %s3996_s13, 0 }
 0x46f   : > { %2241 = sbr.rel (%p2420_p10) target bundleno = 1157 (0x485), region = 127  ;;  %s4128_s18 = smov (!%p2420_p10), %s3990_s20 }
 0x470   : > { %s4129_s23 = smov (!%p2420_p10), %s3902_s15  ;;  %s4005_s28 = smov (!%p2420_p10), 0  }
 0x471   : > { %s4007_s24 = smov (!%p2420_p10), 0  }
 0x474 LB: >> { %v2087_v50 = vld [vmem:[%s3349_s23] sm:$0xff]  ;;  %v2089_v51 = vld [vmem:[%s3349_s23 + $0x8] sm:$0xff]  ;;  %v2091_v52 = vld [vmem:[%s3349_s23 + $0x10] sm:$0xff]  ;;  %s2151_s25 = sadd.s32 1, %s3353_s28  ;;  %s2081_s24 = sadd.s32 1, %s3357_s24   ;;  %s3357_s24 = sphi %s4007_s24, %s2081_s24   ;;  %s3353_s28 = sphi %s4005_s28, %s4132_s28   ;;  %s3349_s23 = sphi %s4129_s23, %s4131_s23   ;;  %s3345_s18 = sphi %s4128_s18, %s4130_s18  }
 0x475   : >> { %2088 = vst [vmem:[%s3345_s18] sm:$0xff] %v2087_v50  ;;  %2090 = vst [vmem:[%s3345_s18 + $0x8] sm:$0xff] %v2089_v51  ;;  %v2093_v53 = vld [vmem:[%s3349_s23 + $0x18] sm:$0xff]  ;;  %v2095_v10 = vld [vmem:[%s3349_s23 + $0x20] sm:$0xff]  ;;  %p2152_p11 = scmp.ge.s32.totalorder %s2151_s25, %s3996_s13  ;;  %p2080_p12 = scmp.ge.s32.totalorder %s2081_s24, %s3996_s13 }
 0x476   : >> { %2092 = vst [vmem:[%s3345_s18 + $0x10] sm:$0xff] %v2091_v52  ;;  %v2097_v54 = vld [vmem:[%s3349_s23 + $0x28] sm:$0xff]  ;;  %2094 = vst [vmem:[%s3345_s18 + $0x18] sm:$0xff] %v2093_v53  ;;  %v2099_v55 = vld [vmem:[%s3349_s23 + $0x30] sm:$0xff] }
 0x477   : >> { %2096 = vst [vmem:[%s3345_s18 + $0x20] sm:$0xff] %v2095_v10  ;;  %2098 = vst [vmem:[%s3345_s18 + $0x28] sm:$0xff] %v2097_v54  ;;  %v2101_v56 = vld [vmem:[%s3349_s23 + $0x38] sm:$0xff]  ;;  %v2103_v58 = vld [vmem:[%s3349_s23 + $0x40] sm:$0xff]  ;;  %s4139_s25 = smov (%p2152_p11, %s2151_s25), 0 }
 0x478   : >> { %2100 = vst [vmem:[%s3345_s18 + $0x30] sm:$0xff] %v2099_v55  ;;  %2102 = vst [vmem:[%s3345_s18 + $0x38] sm:$0xff] %v2101_v56  ;;  %v2105_v59 = vld [vmem:[%s3349_s23 + $0x48] sm:$0xff]  ;;  %v2107_v60 = vld [vmem:[%s3349_s23 + $0x50] sm:$0xff]  ;;  %s2421_s26 = sshll.u32 %s4139_s25, 8  ;;  %s4132_s28 = smov %s4139_s25 }
 0x479   : >> { %2104 = vst [vmem:[%s3345_s18 + $0x40] sm:$0xff] %v2103_v58  ;;  %v2109_v61 = vld [vmem:[%s3349_s23 + $0x58] sm:$0xff]  ;;  %2106 = vst [vmem:[%s3345_s18 + $0x48] sm:$0xff] %v2105_v59  ;;  %v2111_v62 = vld [vmem:[%s3349_s23 + $0x60] sm:$0xff]  ;;  %s4063_s27 = scalar_lea.vmem %s3902_s15, %s2421_s26 [#allocation2]   ;;  %s2157_s29 = scalar_lea.vmem %s3990_s20, %s2421_s26  }
 0x47a   : >> { %2108 = vst [vmem:[%s3345_s18 + $0x50] sm:$0xff] %v2107_v60  ;;  %2110 = vst [vmem:[%s3345_s18 + $0x58] sm:$0xff] %v2109_v61  ;;  %v2113_v63 = vld [vmem:[%s3349_s23 + $0x68] sm:$0xff]  ;;  %v2115_v0 = vld [vmem:[%s3349_s23 + $0x70] sm:$0xff] }
 0x47b   : >> { %2112 = vst [vmem:[%s3345_s18 + $0x60] sm:$0xff] %v2111_v62  ;;  %2114 = vst [vmem:[%s3345_s18 + $0x68] sm:$0xff] %v2113_v63  ;;  %v2117_v1 = vld [vmem:[%s3349_s23 + $0x78] sm:$0xff]  ;;  %v2119_v2 = vld [vmem:[%s3349_s23 + $0x80] sm:$0xff] }
 0x47c   : >> { %2116 = vst [vmem:[%s3345_s18 + $0x70] sm:$0xff] %v2115_v0  ;;  %v2121_v3 = vld [vmem:[%s3349_s23 + $0x88] sm:$0xff]  ;;  %2118 = vst [vmem:[%s3345_s18 + $0x78] sm:$0xff] %v2117_v1  ;;  %v2123_v4 = vld [vmem:[%s3349_s23 + $0x90] sm:$0xff] }
 0x47d   : >> { %2120 = vst [vmem:[%s3345_s18 + $0x80] sm:$0xff] %v2119_v2  ;;  %2122 = vst [vmem:[%s3345_s18 + $0x88] sm:$0xff] %v2121_v3  ;;  %v2125_v5 = vld [vmem:[%s3349_s23 + $0x98] sm:$0xff]  ;;  %v2127_v7 = vld [vmem:[%s3349_s23 + $0xa0] sm:$0xff] }
 0x47e   : >> { %2124 = vst [vmem:[%s3345_s18 + $0x90] sm:$0xff] %v2123_v4  ;;  %2126 = vst [vmem:[%s3345_s18 + $0x98] sm:$0xff] %v2125_v5  ;;  %v2129_v8 = vld [vmem:[%s3349_s23 + $0xa8] sm:$0xff]  ;;  %v2131_v9 = vld [vmem:[%s3349_s23 + $0xb0] sm:$0xff] }
 0x47f   : >> { %2128 = vst [vmem:[%s3345_s18 + $0xa0] sm:$0xff] %v2127_v7  ;;  %v2133_v11 = vld [vmem:[%s3349_s23 + $0xb8] sm:$0xff]  ;;  %2130 = vst [vmem:[%s3345_s18 + $0xa8] sm:$0xff] %v2129_v8  ;;  %v2135_v12 = vld [vmem:[%s3349_s23 + $0xc0] sm:$0xff] }
 0x480   : >> { %2132 = vst [vmem:[%s3345_s18 + $0xb0] sm:$0xff] %v2131_v9  ;;  %2134 = vst [vmem:[%s3345_s18 + $0xb8] sm:$0xff] %v2133_v11  ;;  %v2137_v13 = vld [vmem:[%s3349_s23 + $0xc8] sm:$0xff]  ;;  %v2139_v14 = vld [vmem:[%s3349_s23 + $0xd0] sm:$0xff]  ;;  %2083 = sbr.rel (!%p2080_p12) target bundleno = 1140 (0x474), region = 133 }
 0x481   : >> { %2136 = vst [vmem:[%s3345_s18 + $0xc0] sm:$0xff] %v2135_v12  ;;  %2138 = vst [vmem:[%s3345_s18 + $0xc8] sm:$0xff] %v2137_v13  ;;  %v2141_v15 = vld [vmem:[%s3349_s23 + $0xd8] sm:$0xff]  ;;  %v2143_v16 = vld [vmem:[%s3349_s23 + $0xe0] sm:$0xff] }
 0x482   : >> { %2140 = vst [vmem:[%s3345_s18 + $0xd0] sm:$0xff] %v2139_v14  ;;  %v2145_v42 = vld [vmem:[%s3349_s23 + $0xe8] sm:$0xff]  ;;  %2142 = vst [vmem:[%s3345_s18 + $0xd8] sm:$0xff] %v2141_v15  ;;  %v2147_v17 = vld [vmem:[%s3349_s23 + $0xf0] sm:$0xff] }
 0x483   : >> { %2144 = vst [vmem:[%s3345_s18 + $0xe0] sm:$0xff] %v2143_v16  ;;  %2146 = vst [vmem:[%s3345_s18 + $0xe8] sm:$0xff] %v2145_v42  ;;  %v2149_v19 = vld [vmem:[%s3349_s23 + $0xf8] sm:$0xff]  ;;  %s4131_s23 = smov %s4063_s27 }
 0x484   : >> { %2148 = vst [vmem:[%s3345_s18 + $0xf0] sm:$0xff] %v2147_v17  ;;  %2150 = vst [vmem:[%s3345_s18 + $0xf8] sm:$0xff] %v2149_v19  ;;  %s4130_s18 = smov %s2157_s29 }
 0x485 PF: > { %s4104_s30 = sand.u32 31, %s4137_s11   ;;  %s2432_s5 = sshll.u32 %s3996_s13, 8 }
 0x486   : > { %s2162_s6 = scalar_lea.vmem %s3902_s15, %s2432_s5 [#allocation2]   ;;  %s2164_s7 = scalar_lea.vmem %s3990_s20, %s2432_s5  }
 0x487   : > { %p2426_p13 = scmp.le.s32.totalorder %s4104_s30, 0 }
 0x488   : > { %s3359_s8 = smov (!%p2426_p13), %s2164_s7   ;;  %s3363_s9 = smov (!%p2426_p13), %s2162_s6  }
 0x489   : > { %2255 = sbr.rel (%p2426_p13) target bundleno = 1174 (0x496), region = 138  ;;  %s3367_s10 = smov (!%p2426_p13), 0  }
 0x48a   : > { %s3371_s12 = smov (!%p2426_p13), 0  }
 0x48e LB: >> { %v2174_v20 = vld [vmem:[%s3365_s9] sm:$0xff]  ;;  %s2176_s11 = sadd.s32 1, %s3369_s10  ;;  %s2168_s12 = sadd.s32 1, %s3373_s12   ;;  %s3373_s12 = sphi %s3371_s12, %s2168_s12   ;;  %s3369_s10 = sphi %s3367_s10, %s3368_s10   ;;  %s3365_s9 = sphi %s3363_s9, %s2181_s9   ;;  %s3361_s8 = sphi %s3359_s8, %s2182_s8  }
 0x48f   : >> { %2175 = vst [vmem:[%s3361_s8] sm:$0xff] %v2174_v20  ;;  %p2177_p0 = scmp.ge.s32.totalorder %s2176_s11, %s4104_s30  ;;  %p2167_p1 = scmp.ge.s32.totalorder %s2168_s12, %s4104_s30 }
 0x491   : >> { %s4141_s11 = smov (%p2177_p0, %s2176_s11), 0  ;;  %2170 = sbr.rel (!%p2167_p1) target bundleno = 1166 (0x48e), region = 144 }
 0x492   : >> { %s2427_s15 = sshll.u32 %s4141_s11, 3  ;;  %s3368_s10 = smov %s4141_s11  }
 0x493   : >> { %s2181_s9 = scalar_lea.vmem %s2162_s6, %s2427_s15 [#allocation2]   ;;  %s2182_s8 = scalar_lea.vmem %s2164_s7, %s2427_s15  }
 0x496 PF: > { %p11_p2 = scmp.ge.s32.totalorder %s3415_s19, 5   ;;  %s4133_s15 = smov %s3337_s16 }
 0x497   : > { %s4134_s16 = smov %s3423_s22  ;;  %s4135_s17 = smov %s3415_s19 }
 0x498   :  { %13 = sbr.rel (!%p11_p2) target bundleno = 2 (0x2), region = 155 }

</bundles_post_ra>
